<compile_context>
chip_gen: v5e
topology: v5e:2x2
jax: 0.10.0
libtpu: 0.0.40
codegen_flags: <defaults>
</compile_context>

<pallas_src>
import jax
import jax.numpy as jnp
import numpy as np
from jax.experimental import pallas as pl
from jax.experimental.pallas import tpu as pltpu

N_EMBD = 128
NUM_HEADS = 4
HEAD_SIZE = N_EMBD // NUM_HEADS
EPS = 1e-5


def _layernorm_over_time(z, gamma, beta, eps):
    # z: (BB, T, C); normalize over axis 1 (time), unbiased variance (torch.var default).
    T = z.shape[1]
    m = jnp.mean(z, axis=1, keepdims=True)
    d = z - m
    v = jnp.sum(d * d, axis=1, keepdims=True) / (T - 1)
    return gamma * (d * jax.lax.rsqrt(v + eps)) + beta


def block_kernel(x_ref, wqkv_ref, wo_ref, bo_ref, w1_ref, b1_ref, w2_ref, b2_ref,
                 g1_ref, be1_ref, g2_ref, be2_ref, o_ref):
    x = x_ref[...].astype(jnp.float32)           # (BB, T, C)
    BB, T, C = x.shape
    H = NUM_HEADS
    hs = C // H
    M = BB * T

    # ---- ln1 (over time axis, unbiased var) ----
    xn = _layernorm_over_time(x, g1_ref[...], be1_ref[...], EPS)       # (BB, T, C)

    # ---- fused QKV projection: one (M, C) x (C, 3C) bf16 matmul, f32 accum ----
    xnf = xn.reshape(M, C)
    qkv = jnp.dot(xnf.astype(jnp.bfloat16), wqkv_ref[...],
                  preferred_element_type=jnp.float32)                   # (M, 3C)

    # ---- causal multi-head self-attention (batched over the BB packed batches) ----
    scale = jnp.float32(C) ** -0.5               # module scales by n_embd**-0.5
    row = jax.lax.broadcasted_iota(jnp.int32, (T, T), 0)
    col = jax.lax.broadcasted_iota(jnp.int32, (T, T), 1)
    causal = (row >= col)[None]                  # (1, T, T); hoisted out of head loop

    head_outs = []
    for h in range(H):                           # static unroll over heads
        q = qkv[:, h * hs:(h + 1) * hs].reshape(BB, T, hs)
        k = qkv[:, C + h * hs:C + (h + 1) * hs].reshape(BB, T, hs)
        v = qkv[:, 2 * C + h * hs:2 * C + (h + 1) * hs].reshape(BB, T, hs)
        wei = jnp.einsum('bqd,bkd->bqk',
                         q.astype(jnp.bfloat16), k.astype(jnp.bfloat16),
                         preferred_element_type=jnp.float32) * scale    # (BB, T, T)
        wei = jnp.where(causal, wei, -jnp.inf)   # diagonal always unmasked -> no NaN rows
        wmax = jnp.max(wei, axis=-1, keepdims=True)
        e = jnp.exp(wei - wmax)
        p = e * pl.reciprocal(jnp.sum(e, axis=-1, keepdims=True), approx=True)
        head_outs.append(jnp.einsum('bqk,bkd->bqd',
                                    p.astype(jnp.bfloat16), v.astype(jnp.bfloat16),
                                    preferred_element_type=jnp.float32))  # (BB, T, hs)

    # concat heads (matches PyTorch torch.cat order) -> one wide output projection
    heads_cat = jnp.concatenate(head_outs, axis=-1).reshape(M, C)
    attn = jnp.dot(heads_cat.astype(jnp.bfloat16), wo_ref[...],
                   preferred_element_type=jnp.float32) + bo_ref[...]
    x1 = x + attn.reshape(BB, T, C)              # residual 1

    # ---- ln2 + feed forward ----
    xn2 = _layernorm_over_time(x1, g2_ref[...], be2_ref[...], EPS).reshape(M, C)
    h1 = jnp.dot(xn2.astype(jnp.bfloat16), w1_ref[...],
                 preferred_element_type=jnp.float32) + b1_ref[...]
    h1 = jnp.maximum(h1, 0.0)
    ff = jnp.dot(h1.astype(jnp.bfloat16), w2_ref[...],
                 preferred_element_type=jnp.float32) + b2_ref[...]

    o_ref[...] = (x1 + ff.reshape(BB, T, C)).astype(o_ref.dtype)   # residual 2


def _pick_block_b(B):
    # Largest divisor of B, capped at 32, that still leaves >= 2 grid steps
    # (so both TensorCores get work on v7x). Falls back to 1.
    cap = min(32, max(1, B // 2)) if B >= 2 else 1
    bb = 1
    for cand in range(1, cap + 1):
        if B % cand == 0:
            bb = cand
    return bb


def gpt2_block(x, params, *, block_b=None):
    B, T, C = x.shape
    assert T >= 2, "LayerNorm over time uses unbiased variance (ddof=1); requires T >= 2"
    wq, wk, wv, wo, bo, w1, b1, w2, b2, g1, be1, g2, be2 = params
    H, _, hs = wq.shape

    if block_b is None:
        block_b = _pick_block_b(B)
    assert B % block_b == 0

    # Fuse Q/K/V into one (C, 3C) weight: columns [q heads | k heads | v heads],
    # each section head-major so in-kernel slicing matches the PyTorch concat order.
    wq_cat = jnp.transpose(wq, (1, 0, 2)).reshape(C, H * hs)
    wk_cat = jnp.transpose(wk, (1, 0, 2)).reshape(C, H * hs)
    wv_cat = jnp.transpose(wv, (1, 0, 2)).reshape(C, H * hs)
    wqkv = jnp.concatenate([wq_cat, wk_cat, wv_cat], axis=1)   # (C, 3C)

    # bf16 weights at the MXU (halves weight DMA bytes); biases / LN params stay fp32.
    wqkv_bf = wqkv.astype(jnp.bfloat16)
    wo_bf = wo.astype(jnp.bfloat16)
    w1_bf = w1.astype(jnp.bfloat16)
    w2_bf = w2.astype(jnp.bfloat16)

    def full(shape):
        n = len(shape)
        return pl.BlockSpec(shape, lambda b: (0,) * n)   # constant block -> stays resident

    return pl.pallas_call(
        block_kernel,
        out_shape=jax.ShapeDtypeStruct((B, T, C), x.dtype),
        grid_spec=pltpu.PrefetchScalarGridSpec(
            num_scalar_prefetch=0,
            grid=(B // block_b,),
            in_specs=[
                pl.BlockSpec((block_b, T, C), lambda b: (b, 0, 0)),   # x
                full((C, 3 * C)),     # wqkv (bf16)
                full((C, C)),         # wo   (bf16)
                full((1, C)),         # bo
                full((C, 4 * C)),     # w1   (bf16)
                full((1, 4 * C)),     # b1
                full((4 * C, C)),     # w2   (bf16)
                full((1, C)),         # b2
                full((1, C)),         # gamma1
                full((1, C)),         # beta1
                full((1, C)),         # gamma2
                full((1, C)),         # beta2
            ],
            out_specs=pl.BlockSpec((block_b, T, C), lambda b: (b, 0, 0)),
        ),
        compiler_params=pltpu.CompilerParams(
            dimension_semantics=("parallel",),
            vmem_limit_bytes=32 * 1024 * 1024,   # explicit; usage is well under this on all gens
        ),
    )(x, wqkv_bf, wo_bf, bo, w1_bf, b1, w2_bf, b2, g1, be1, g2, be2)


def reference_block(x, params):
    """Pure-JAX fp32 reference mirroring the PyTorch Block forward (eval mode)."""
    wq, wk, wv, wo, bo, w1, b1, w2, b2, g1, be1, g2, be2 = params
    B, T, C = x.shape
    H, _, hs = wq.shape

    def ln(z, g, b):  # normalize over time axis, unbiased var
        m = jnp.mean(z, axis=1, keepdims=True)
        v = jnp.var(z, axis=1, keepdims=True, ddof=1)
        return g * ((z - m) / jnp.sqrt(v + EPS)) + b

    xn = ln(x, g1, be1)
    causal = jnp.tril(jnp.ones((T, T), dtype=bool))
    outs = []
    for h in range(H):
        q = xn @ wq[h]
        k = xn @ wk[h]
        v = xn @ wv[h]
        wei = (q @ jnp.swapaxes(k, 1, 2)) * (C ** -0.5)
        wei = jnp.where(causal[None], wei, -jnp.inf)
        wei = jax.nn.softmax(wei, axis=-1)
        outs.append(wei @ v)
    cat = jnp.concatenate(outs, axis=-1)
    x1 = x + (cat @ wo + bo)
    xn2 = ln(x1, g2, be2)
    ff = jnp.maximum(xn2 @ w1 + b1, 0.0) @ w2 + b2
    return x1 + ff


def make_params(key):
    ks = jax.random.split(key, 8)
    scale = 0.02
    wq = scale * jax.random.normal(ks[0], (NUM_HEADS, N_EMBD, HEAD_SIZE), jnp.float32)
    wk = scale * jax.random.normal(ks[1], (NUM_HEADS, N_EMBD, HEAD_SIZE), jnp.float32)
    wv = scale * jax.random.normal(ks[2], (NUM_HEADS, N_EMBD, HEAD_SIZE), jnp.float32)
    wo = scale * jax.random.normal(ks[3], (N_EMBD, N_EMBD), jnp.float32)
    bo = scale * jax.random.normal(ks[4], (1, N_EMBD), jnp.float32)
    w1 = scale * jax.random.normal(ks[5], (N_EMBD, 4 * N_EMBD), jnp.float32)
    b1 = scale * jax.random.normal(ks[6], (1, 4 * N_EMBD), jnp.float32)
    w2 = scale * jax.random.normal(ks[7], (4 * N_EMBD, N_EMBD), jnp.float32)
    b2 = jnp.zeros((1, N_EMBD), jnp.float32)
    g1 = jnp.ones((1, N_EMBD), jnp.float32)
    be1 = jnp.zeros((1, N_EMBD), jnp.float32)
    g2 = jnp.ones((1, N_EMBD), jnp.float32)
    be2 = jnp.zeros((1, N_EMBD), jnp.float32)
    return (wq, wk, wv, wo, bo, w1, b1, w2, b2, g1, be1, g2, be2)


if __name__ == "__main__":
    key = jax.random.PRNGKey(0)
    kx, kp = jax.random.split(key)
    B, T = 8, 8
    x = jax.random.normal(kx, (B, T, N_EMBD), jnp.float32)
    params = make_params(kp)

    out = jax.block_until_ready(gpt2_block(x, params))   # BB=4 -> 2 grid steps
    ref = jax.block_until_ready(reference_block(x, params))

    np.testing.assert_allclose(np.asarray(out), np.asarray(ref), rtol=2e-2, atol=2e-2)
    print("KERNEL_OK")
</pallas_src>

<mosaic_0001>
module attributes {stable_mosaic.version = 11 : i64} {
  func.func @block_kernel(%arg0: i32, %arg1: memref<4x8x128xf32, #tpu.memory_space<vmem>>, %arg2: memref<128x384xbf16, #tpu.memory_space<vmem>>, %arg3: memref<128x128xbf16, #tpu.memory_space<vmem>>, %arg4: memref<1x128xf32, #tpu.memory_space<vmem>>, %arg5: memref<128x512xbf16, #tpu.memory_space<vmem>>, %arg6: memref<1x512xf32, #tpu.memory_space<vmem>>, %arg7: memref<512x128xbf16, #tpu.memory_space<vmem>>, %arg8: memref<1x128xf32, #tpu.memory_space<vmem>>, %arg9: memref<1x128xf32, #tpu.memory_space<vmem>>, %arg10: memref<1x128xf32, #tpu.memory_space<vmem>>, %arg11: memref<1x128xf32, #tpu.memory_space<vmem>>, %arg12: memref<1x128xf32, #tpu.memory_space<vmem>>, %arg13: memref<4x8x128xf32, #tpu.memory_space<vmem>>) attributes {dimension_semantics = [#tpu.dimension_semantics<parallel>], iteration_bounds = array<i64: 2>, scalar_prefetch = 0 : i64, scratch_operands = 0 : i64, tpu.core_type = #tpu.core_type<tc>, window_params = [{transform_indices = @transform_0, window_bounds = array<i64: 4, 8, 128>}, {pipeline_mode = #tpu.pipeline_mode<synchronous>, transform_indices = @transform_1, window_bounds = array<i64: 128, 384>}, {pipeline_mode = #tpu.pipeline_mode<synchronous>, transform_indices = @transform_2, window_bounds = array<i64: 128, 128>}, {pipeline_mode = #tpu.pipeline_mode<synchronous>, transform_indices = @transform_3, window_bounds = array<i64: 1, 128>}, {pipeline_mode = #tpu.pipeline_mode<synchronous>, transform_indices = @transform_4, window_bounds = array<i64: 128, 512>}, {pipeline_mode = #tpu.pipeline_mode<synchronous>, transform_indices = @transform_5, window_bounds = array<i64: 1, 512>}, {pipeline_mode = #tpu.pipeline_mode<synchronous>, transform_indices = @transform_6, window_bounds = array<i64: 512, 128>}, {pipeline_mode = #tpu.pipeline_mode<synchronous>, transform_indices = @transform_7, window_bounds = array<i64: 1, 128>}, {pipeline_mode = #tpu.pipeline_mode<synchronous>, transform_indices = @transform_8, window_bounds = array<i64: 1, 128>}, {pipeline_mode = #tpu.pipeline_mode<synchronous>, transform_indices = @transform_9, window_bounds = array<i64: 1, 128>}, {pipeline_mode = #tpu.pipeline_mode<synchronous>, transform_indices = @transform_10, window_bounds = array<i64: 1, 128>}, {pipeline_mode = #tpu.pipeline_mode<synchronous>, transform_indices = @transform_11, window_bounds = array<i64: 1, 128>}, {transform_indices = @transform_12, window_bounds = array<i64: 4, 8, 128>}]} {
    %c0 = arith.constant 0 : index
    %c0_0 = arith.constant 0 : index
    %c0_1 = arith.constant 0 : index
    %0 = vector.load %arg1[%c0, %c0_0, %c0_1] : memref<4x8x128xf32, #tpu.memory_space<vmem>>, vector<4x8x128xf32>
    %c0_2 = arith.constant 0 : index
    %c0_3 = arith.constant 0 : index
    %1 = vector.load %arg9[%c0_2, %c0_3] : memref<1x128xf32, #tpu.memory_space<vmem>>, vector<1x128xf32>
    %c0_4 = arith.constant 0 : index
    %c0_5 = arith.constant 0 : index
    %2 = vector.load %arg10[%c0_4, %c0_5] : memref<1x128xf32, #tpu.memory_space<vmem>>, vector<1x128xf32>
    %cst = arith.constant dense<0.000000e+00> : vector<4x128xf32>
    %3 = vector.multi_reduction <add>, %0, %cst [1] : vector<4x8x128xf32> to vector<4x128xf32>
    %4 = vector.shape_cast %3 : vector<4x128xf32> to vector<4x1x128xf32>
    %cst_6 = arith.constant 8.000000e+00 : f32
    %5 = vector.broadcast %cst_6 : f32 to vector<4x1x128xf32>
    %6 = arith.divf %4, %5 : vector<4x1x128xf32>
    %7 = vector.broadcast %6 : vector<4x1x128xf32> to vector<4x8x128xf32>
    %8 = arith.subf %0, %7 : vector<4x8x128xf32>
    %9 = arith.mulf %8, %8 : vector<4x8x128xf32>
    %cst_7 = arith.constant dense<0.000000e+00> : vector<4x128xf32>
    %10 = vector.multi_reduction <add>, %9, %cst_7 [1] : vector<4x8x128xf32> to vector<4x128xf32>
    %11 = vector.shape_cast %10 : vector<4x128xf32> to vector<4x1x128xf32>
    %cst_8 = arith.constant 7.000000e+00 : f32
    %12 = vector.broadcast %cst_8 : f32 to vector<4x1x128xf32>
    %13 = arith.divf %11, %12 : vector<4x1x128xf32>
    %cst_9 = arith.constant 9.99999974E-6 : f32
    %14 = vector.broadcast %cst_9 : f32 to vector<4x1x128xf32>
    %15 = arith.addf %13, %14 : vector<4x1x128xf32>
    %16 = math.rsqrt %15 : vector<4x1x128xf32>
    %17 = vector.broadcast %16 : vector<4x1x128xf32> to vector<4x8x128xf32>
    %18 = arith.mulf %8, %17 : vector<4x8x128xf32>
    %19 = vector.shape_cast %1 : vector<1x128xf32> to vector<1x1x128xf32>
    %20 = vector.broadcast %19 : vector<1x1x128xf32> to vector<4x8x128xf32>
    %21 = arith.mulf %20, %18 : vector<4x8x128xf32>
    %22 = vector.shape_cast %2 : vector<1x128xf32> to vector<1x1x128xf32>
    %23 = vector.broadcast %22 : vector<1x1x128xf32> to vector<4x8x128xf32>
    %24 = arith.addf %21, %23 : vector<4x8x128xf32>
    %25 = vector.shape_cast %24 : vector<4x8x128xf32> to vector<32x128xf32>
    %26 = arith.truncf %25 : vector<32x128xf32> to vector<32x128xbf16>
    %c0_10 = arith.constant 0 : index
    %c0_11 = arith.constant 0 : index
    %27 = vector.load %arg2[%c0_10, %c0_11] : memref<128x384xbf16, #tpu.memory_space<vmem>>, vector<128x384xbf16>
    %cst_12 = arith.constant dense<0.000000e+00> : vector<32x384xf32>
    %28 = tpu.matmul %26, %27, %cst_12 {dimension_numbers = #tpu.dot_dimension_numbers<[1], [0], [0], [1], [0, 0, 1, 1], [], []>} : vector<32x128xbf16>, vector<128x384xbf16>, vector<32x384xf32> -> vector<32x384xf32>
    %cst_13 = arith.constant 1.280000e+02 : f32
    %cst_14 = arith.constant -5.000000e-01 : f32
    %29 = math.powf %cst_13, %cst_14 : f32
    %30 = tpu.iota {dimensions = array<i32: 0>} : vector<8x8xi32>
    %31 = tpu.iota {dimensions = array<i32: 1>} : vector<8x8xi32>
    %32 = arith.cmpi sge, %30, %31 : vector<8x8xi32>
    %33 = vector.shape_cast %32 : vector<8x8xi1> to vector<1x8x8xi1>
    %34 = vector.extract_strided_slice %28 {offsets = [0, 0], sizes = [32, 32], strides = [1, 1]} : vector<32x384xf32> to vector<32x32xf32>
    %35 = vector.shape_cast %34 : vector<32x32xf32> to vector<4x8x32xf32>
    %36 = vector.extract_strided_slice %28 {offsets = [0, 128], sizes = [32, 32], strides = [1, 1]} : vector<32x384xf32> to vector<32x32xf32>
    %37 = vector.shape_cast %36 : vector<32x32xf32> to vector<4x8x32xf32>
    %38 = vector.extract_strided_slice %28 {offsets = [0, 256], sizes = [32, 32], strides = [1, 1]} : vector<32x384xf32> to vector<32x32xf32>
    %39 = vector.shape_cast %38 : vector<32x32xf32> to vector<4x8x32xf32>
    %40 = arith.truncf %35 : vector<4x8x32xf32> to vector<4x8x32xbf16>
    %41 = arith.truncf %37 : vector<4x8x32xf32> to vector<4x8x32xbf16>
    "tpu.trace_start"() <{level = 10 : i32, message = "bqd,bkd->bqk"}> : () -> ()
    %cst_15 = arith.constant dense<0.000000e+00> : vector<4x8x8xf32>
    %42 = tpu.matmul %40, %41, %cst_15 {dimension_numbers = #tpu.dot_dimension_numbers<[2], [2], [1], [1], [0, 0, 0, 1, 1, 1], [0], [0]>} : vector<4x8x32xbf16>, vector<4x8x32xbf16>, vector<4x8x8xf32> -> vector<4x8x8xf32>
    "tpu.trace_stop"() : () -> ()
    %43 = vector.broadcast %29 : f32 to vector<4x8x8xf32>
    %44 = arith.mulf %42, %43 : vector<4x8x8xf32>
    %cst_16 = arith.constant 0xFF800000 : f32
    %45 = vector.shape_cast %33 : vector<1x8x8xi1> to vector<1x8x8xi1>
    %46 = vector.broadcast %45 : vector<1x8x8xi1> to vector<4x8x8xi1>
    %47 = vector.broadcast %cst_16 : f32 to vector<4x8x8xf32>
    %48 = arith.select %46, %44, %47 : vector<4x8x8xi1>, vector<4x8x8xf32>
    %cst_17 = arith.constant dense<0xFF800000> : vector<4x8xf32>
    %49 = vector.multi_reduction <maximumf>, %48, %cst_17 [2] : vector<4x8x8xf32> to vector<4x8xf32>
    %50 = vector.shape_cast %49 : vector<4x8xf32> to vector<4x8x1xf32>
    %51 = vector.broadcast %50 : vector<4x8x1xf32> to vector<4x8x8xf32>
    %52 = arith.subf %48, %51 : vector<4x8x8xf32>
    %53 = math.exp %52 : vector<4x8x8xf32>
    %cst_18 = arith.constant dense<0.000000e+00> : vector<4x8xf32>
    %54 = vector.multi_reduction <add>, %53, %cst_18 [2] : vector<4x8x8xf32> to vector<4x8xf32>
    %55 = vector.shape_cast %54 : vector<4x8xf32> to vector<4x8x1xf32>
    %56 = tpu.reciprocal %55 {approx = true} : vector<4x8x1xf32> -> vector<4x8x1xf32>
    %57 = vector.broadcast %56 : vector<4x8x1xf32> to vector<4x8x8xf32>
    %58 = arith.mulf %53, %57 : vector<4x8x8xf32>
    %59 = arith.truncf %58 : vector<4x8x8xf32> to vector<4x8x8xbf16>
    %60 = arith.truncf %39 : vector<4x8x32xf32> to vector<4x8x32xbf16>
    "tpu.trace_start"() <{level = 10 : i32, message = "bqk,bkd->bqd"}> : () -> ()
    %cst_19 = arith.constant dense<0.000000e+00> : vector<4x8x32xf32>
    %61 = tpu.matmul %59, %60, %cst_19 {dimension_numbers = #tpu.dot_dimension_numbers<[2], [1], [1], [2], [0, 0, 0, 1, 1, 2], [0], [0]>} : vector<4x8x8xbf16>, vector<4x8x32xbf16>, vector<4x8x32xf32> -> vector<4x8x32xf32>
    "tpu.trace_stop"() : () -> ()
    %62 = vector.extract_strided_slice %28 {offsets = [0, 32], sizes = [32, 32], strides = [1, 1]} : vector<32x384xf32> to vector<32x32xf32>
    %63 = vector.shape_cast %62 : vector<32x32xf32> to vector<4x8x32xf32>
    %64 = vector.extract_strided_slice %28 {offsets = [0, 160], sizes = [32, 32], strides = [1, 1]} : vector<32x384xf32> to vector<32x32xf32>
    %65 = vector.shape_cast %64 : vector<32x32xf32> to vector<4x8x32xf32>
    %66 = vector.extract_strided_slice %28 {offsets = [0, 288], sizes = [32, 32], strides = [1, 1]} : vector<32x384xf32> to vector<32x32xf32>
    %67 = vector.shape_cast %66 : vector<32x32xf32> to vector<4x8x32xf32>
    %68 = arith.truncf %63 : vector<4x8x32xf32> to vector<4x8x32xbf16>
    %69 = arith.truncf %65 : vector<4x8x32xf32> to vector<4x8x32xbf16>
    "tpu.trace_start"() <{level = 10 : i32, message = "bqd,bkd->bqk"}> : () -> ()
    %cst_20 = arith.constant dense<0.000000e+00> : vector<4x8x8xf32>
    %70 = tpu.matmul %68, %69, %cst_20 {dimension_numbers = #tpu.dot_dimension_numbers<[2], [2], [1], [1], [0, 0, 0, 1, 1, 1], [0], [0]>} : vector<4x8x32xbf16>, vector<4x8x32xbf16>, vector<4x8x8xf32> -> vector<4x8x8xf32>
    "tpu.trace_stop"() : () -> ()
    %71 = vector.broadcast %29 : f32 to vector<4x8x8xf32>
    %72 = arith.mulf %70, %71 : vector<4x8x8xf32>
    %cst_21 = arith.constant 0xFF800000 : f32
    %73 = vector.shape_cast %33 : vector<1x8x8xi1> to vector<1x8x8xi1>
    %74 = vector.broadcast %73 : vector<1x8x8xi1> to vector<4x8x8xi1>
    %75 = vector.broadcast %cst_21 : f32 to vector<4x8x8xf32>
    %76 = arith.select %74, %72, %75 : vector<4x8x8xi1>, vector<4x8x8xf32>
    %cst_22 = arith.constant dense<0xFF800000> : vector<4x8xf32>
    %77 = vector.multi_reduction <maximumf>, %76, %cst_22 [2] : vector<4x8x8xf32> to vector<4x8xf32>
    %78 = vector.shape_cast %77 : vector<4x8xf32> to vector<4x8x1xf32>
    %79 = vector.broadcast %78 : vector<4x8x1xf32> to vector<4x8x8xf32>
    %80 = arith.subf %76, %79 : vector<4x8x8xf32>
    %81 = math.exp %80 : vector<4x8x8xf32>
    %cst_23 = arith.constant dense<0.000000e+00> : vector<4x8xf32>
    %82 = vector.multi_reduction <add>, %81, %cst_23 [2] : vector<4x8x8xf32> to vector<4x8xf32>
    %83 = vector.shape_cast %82 : vector<4x8xf32> to vector<4x8x1xf32>
    %84 = tpu.reciprocal %83 {approx = true} : vector<4x8x1xf32> -> vector<4x8x1xf32>
    %85 = vector.broadcast %84 : vector<4x8x1xf32> to vector<4x8x8xf32>
    %86 = arith.mulf %81, %85 : vector<4x8x8xf32>
    %87 = arith.truncf %86 : vector<4x8x8xf32> to vector<4x8x8xbf16>
    %88 = arith.truncf %67 : vector<4x8x32xf32> to vector<4x8x32xbf16>
    "tpu.trace_start"() <{level = 10 : i32, message = "bqk,bkd->bqd"}> : () -> ()
    %cst_24 = arith.constant dense<0.000000e+00> : vector<4x8x32xf32>
    %89 = tpu.matmul %87, %88, %cst_24 {dimension_numbers = #tpu.dot_dimension_numbers<[2], [1], [1], [2], [0, 0, 0, 1, 1, 2], [0], [0]>} : vector<4x8x8xbf16>, vector<4x8x32xbf16>, vector<4x8x32xf32> -> vector<4x8x32xf32>
    "tpu.trace_stop"() : () -> ()
    %90 = vector.extract_strided_slice %28 {offsets = [0, 64], sizes = [32, 32], strides = [1, 1]} : vector<32x384xf32> to vector<32x32xf32>
    %91 = vector.shape_cast %90 : vector<32x32xf32> to vector<4x8x32xf32>
    %92 = vector.extract_strided_slice %28 {offsets = [0, 192], sizes = [32, 32], strides = [1, 1]} : vector<32x384xf32> to vector<32x32xf32>
    %93 = vector.shape_cast %92 : vector<32x32xf32> to vector<4x8x32xf32>
    %94 = vector.extract_strided_slice %28 {offsets = [0, 320], sizes = [32, 32], strides = [1, 1]} : vector<32x384xf32> to vector<32x32xf32>
    %95 = vector.shape_cast %94 : vector<32x32xf32> to vector<4x8x32xf32>
    %96 = arith.truncf %91 : vector<4x8x32xf32> to vector<4x8x32xbf16>
    %97 = arith.truncf %93 : vector<4x8x32xf32> to vector<4x8x32xbf16>
    "tpu.trace_start"() <{level = 10 : i32, message = "bqd,bkd->bqk"}> : () -> ()
    %cst_25 = arith.constant dense<0.000000e+00> : vector<4x8x8xf32>
    %98 = tpu.matmul %96, %97, %cst_25 {dimension_numbers = #tpu.dot_dimension_numbers<[2], [2], [1], [1], [0, 0, 0, 1, 1, 1], [0], [0]>} : vector<4x8x32xbf16>, vector<4x8x32xbf16>, vector<4x8x8xf32> -> vector<4x8x8xf32>
    "tpu.trace_stop"() : () -> ()
    %99 = vector.broadcast %29 : f32 to vector<4x8x8xf32>
    %100 = arith.mulf %98, %99 : vector<4x8x8xf32>
    %cst_26 = arith.constant 0xFF800000 : f32
    %101 = vector.shape_cast %33 : vector<1x8x8xi1> to vector<1x8x8xi1>
    %102 = vector.broadcast %101 : vector<1x8x8xi1> to vector<4x8x8xi1>
    %103 = vector.broadcast %cst_26 : f32 to vector<4x8x8xf32>
    %104 = arith.select %102, %100, %103 : vector<4x8x8xi1>, vector<4x8x8xf32>
    %cst_27 = arith.constant dense<0xFF800000> : vector<4x8xf32>
    %105 = vector.multi_reduction <maximumf>, %104, %cst_27 [2] : vector<4x8x8xf32> to vector<4x8xf32>
    %106 = vector.shape_cast %105 : vector<4x8xf32> to vector<4x8x1xf32>
    %107 = vector.broadcast %106 : vector<4x8x1xf32> to vector<4x8x8xf32>
    %108 = arith.subf %104, %107 : vector<4x8x8xf32>
    %109 = math.exp %108 : vector<4x8x8xf32>
    %cst_28 = arith.constant dense<0.000000e+00> : vector<4x8xf32>
    %110 = vector.multi_reduction <add>, %109, %cst_28 [2] : vector<4x8x8xf32> to vector<4x8xf32>
    %111 = vector.shape_cast %110 : vector<4x8xf32> to vector<4x8x1xf32>
    %112 = tpu.reciprocal %111 {approx = true} : vector<4x8x1xf32> -> vector<4x8x1xf32>
    %113 = vector.broadcast %112 : vector<4x8x1xf32> to vector<4x8x8xf32>
    %114 = arith.mulf %109, %113 : vector<4x8x8xf32>
    %115 = arith.truncf %114 : vector<4x8x8xf32> to vector<4x8x8xbf16>
    %116 = arith.truncf %95 : vector<4x8x32xf32> to vector<4x8x32xbf16>
    "tpu.trace_start"() <{level = 10 : i32, message = "bqk,bkd->bqd"}> : () -> ()
    %cst_29 = arith.constant dense<0.000000e+00> : vector<4x8x32xf32>
    %117 = tpu.matmul %115, %116, %cst_29 {dimension_numbers = #tpu.dot_dimension_numbers<[2], [1], [1], [2], [0, 0, 0, 1, 1, 2], [0], [0]>} : vector<4x8x8xbf16>, vector<4x8x32xbf16>, vector<4x8x32xf32> -> vector<4x8x32xf32>
    "tpu.trace_stop"() : () -> ()
    %118 = vector.extract_strided_slice %28 {offsets = [0, 96], sizes = [32, 32], strides = [1, 1]} : vector<32x384xf32> to vector<32x32xf32>
    %119 = vector.shape_cast %118 : vector<32x32xf32> to vector<4x8x32xf32>
    %120 = vector.extract_strided_slice %28 {offsets = [0, 224], sizes = [32, 32], strides = [1, 1]} : vector<32x384xf32> to vector<32x32xf32>
    %121 = vector.shape_cast %120 : vector<32x32xf32> to vector<4x8x32xf32>
    %122 = vector.extract_strided_slice %28 {offsets = [0, 352], sizes = [32, 32], strides = [1, 1]} : vector<32x384xf32> to vector<32x32xf32>
    %123 = vector.shape_cast %122 : vector<32x32xf32> to vector<4x8x32xf32>
    %124 = arith.truncf %119 : vector<4x8x32xf32> to vector<4x8x32xbf16>
    %125 = arith.truncf %121 : vector<4x8x32xf32> to vector<4x8x32xbf16>
    "tpu.trace_start"() <{level = 10 : i32, message = "bqd,bkd->bqk"}> : () -> ()
    %cst_30 = arith.constant dense<0.000000e+00> : vector<4x8x8xf32>
    %126 = tpu.matmul %124, %125, %cst_30 {dimension_numbers = #tpu.dot_dimension_numbers<[2], [2], [1], [1], [0, 0, 0, 1, 1, 1], [0], [0]>} : vector<4x8x32xbf16>, vector<4x8x32xbf16>, vector<4x8x8xf32> -> vector<4x8x8xf32>
    "tpu.trace_stop"() : () -> ()
    %127 = vector.broadcast %29 : f32 to vector<4x8x8xf32>
    %128 = arith.mulf %126, %127 : vector<4x8x8xf32>
    %cst_31 = arith.constant 0xFF800000 : f32
    %129 = vector.shape_cast %33 : vector<1x8x8xi1> to vector<1x8x8xi1>
    %130 = vector.broadcast %129 : vector<1x8x8xi1> to vector<4x8x8xi1>
    %131 = vector.broadcast %cst_31 : f32 to vector<4x8x8xf32>
    %132 = arith.select %130, %128, %131 : vector<4x8x8xi1>, vector<4x8x8xf32>
    %cst_32 = arith.constant dense<0xFF800000> : vector<4x8xf32>
    %133 = vector.multi_reduction <maximumf>, %132, %cst_32 [2] : vector<4x8x8xf32> to vector<4x8xf32>
    %134 = vector.shape_cast %133 : vector<4x8xf32> to vector<4x8x1xf32>
    %135 = vector.broadcast %134 : vector<4x8x1xf32> to vector<4x8x8xf32>
    %136 = arith.subf %132, %135 : vector<4x8x8xf32>
    %137 = math.exp %136 : vector<4x8x8xf32>
    %cst_33 = arith.constant dense<0.000000e+00> : vector<4x8xf32>
    %138 = vector.multi_reduction <add>, %137, %cst_33 [2] : vector<4x8x8xf32> to vector<4x8xf32>
    %139 = vector.shape_cast %138 : vector<4x8xf32> to vector<4x8x1xf32>
    %140 = tpu.reciprocal %139 {approx = true} : vector<4x8x1xf32> -> vector<4x8x1xf32>
    %141 = vector.broadcast %140 : vector<4x8x1xf32> to vector<4x8x8xf32>
    %142 = arith.mulf %137, %141 : vector<4x8x8xf32>
    %143 = arith.truncf %142 : vector<4x8x8xf32> to vector<4x8x8xbf16>
    %144 = arith.truncf %123 : vector<4x8x32xf32> to vector<4x8x32xbf16>
    "tpu.trace_start"() <{level = 10 : i32, message = "bqk,bkd->bqd"}> : () -> ()
    %cst_34 = arith.constant dense<0.000000e+00> : vector<4x8x32xf32>
    %145 = tpu.matmul %143, %144, %cst_34 {dimension_numbers = #tpu.dot_dimension_numbers<[2], [1], [1], [2], [0, 0, 0, 1, 1, 2], [0], [0]>} : vector<4x8x8xbf16>, vector<4x8x32xbf16>, vector<4x8x32xf32> -> vector<4x8x32xf32>
    "tpu.trace_stop"() : () -> ()
    %146 = tpu.concatenate %61, %89, %117, %145 in 2 : vector<4x8x32xf32>, vector<4x8x32xf32>, vector<4x8x32xf32>, vector<4x8x32xf32> -> vector<4x8x128xf32>
    %147 = vector.shape_cast %146 : vector<4x8x128xf32> to vector<32x128xf32>
    %148 = arith.truncf %147 : vector<32x128xf32> to vector<32x128xbf16>
    %c0_35 = arith.constant 0 : index
    %c0_36 = arith.constant 0 : index
    %149 = vector.load %arg3[%c0_35, %c0_36] : memref<128x128xbf16, #tpu.memory_space<vmem>>, vector<128x128xbf16>
    %cst_37 = arith.constant dense<0.000000e+00> : vector<32x128xf32>
    %150 = tpu.matmul %148, %149, %cst_37 {dimension_numbers = #tpu.dot_dimension_numbers<[1], [0], [0], [1], [0, 0, 1, 1], [], []>} : vector<32x128xbf16>, vector<128x128xbf16>, vector<32x128xf32> -> vector<32x128xf32>
    %c0_38 = arith.constant 0 : index
    %c0_39 = arith.constant 0 : index
    %151 = vector.load %arg4[%c0_38, %c0_39] : memref<1x128xf32, #tpu.memory_space<vmem>>, vector<1x128xf32>
    %152 = vector.broadcast %151 : vector<1x128xf32> to vector<32x128xf32>
    %153 = arith.addf %150, %152 : vector<32x128xf32>
    %154 = vector.shape_cast %153 : vector<32x128xf32> to vector<4x8x128xf32>
    %155 = arith.addf %0, %154 : vector<4x8x128xf32>
    %c0_40 = arith.constant 0 : index
    %c0_41 = arith.constant 0 : index
    %156 = vector.load %arg11[%c0_40, %c0_41] : memref<1x128xf32, #tpu.memory_space<vmem>>, vector<1x128xf32>
    %c0_42 = arith.constant 0 : index
    %c0_43 = arith.constant 0 : index
    %157 = vector.load %arg12[%c0_42, %c0_43] : memref<1x128xf32, #tpu.memory_space<vmem>>, vector<1x128xf32>
    %cst_44 = arith.constant dense<0.000000e+00> : vector<4x128xf32>
    %158 = vector.multi_reduction <add>, %155, %cst_44 [1] : vector<4x8x128xf32> to vector<4x128xf32>
    %159 = vector.shape_cast %158 : vector<4x128xf32> to vector<4x1x128xf32>
    %cst_45 = arith.constant 8.000000e+00 : f32
    %160 = vector.broadcast %cst_45 : f32 to vector<4x1x128xf32>
    %161 = arith.divf %159, %160 : vector<4x1x128xf32>
    %162 = vector.broadcast %161 : vector<4x1x128xf32> to vector<4x8x128xf32>
    %163 = arith.subf %155, %162 : vector<4x8x128xf32>
    %164 = arith.mulf %163, %163 : vector<4x8x128xf32>
    %cst_46 = arith.constant dense<0.000000e+00> : vector<4x128xf32>
    %165 = vector.multi_reduction <add>, %164, %cst_46 [1] : vector<4x8x128xf32> to vector<4x128xf32>
    %166 = vector.shape_cast %165 : vector<4x128xf32> to vector<4x1x128xf32>
    %cst_47 = arith.constant 7.000000e+00 : f32
    %167 = vector.broadcast %cst_47 : f32 to vector<4x1x128xf32>
    %168 = arith.divf %166, %167 : vector<4x1x128xf32>
    %cst_48 = arith.constant 9.99999974E-6 : f32
    %169 = vector.broadcast %cst_48 : f32 to vector<4x1x128xf32>
    %170 = arith.addf %168, %169 : vector<4x1x128xf32>
    %171 = math.rsqrt %170 : vector<4x1x128xf32>
    %172 = vector.broadcast %171 : vector<4x1x128xf32> to vector<4x8x128xf32>
    %173 = arith.mulf %163, %172 : vector<4x8x128xf32>
    %174 = vector.shape_cast %156 : vector<1x128xf32> to vector<1x1x128xf32>
    %175 = vector.broadcast %174 : vector<1x1x128xf32> to vector<4x8x128xf32>
    %176 = arith.mulf %175, %173 : vector<4x8x128xf32>
    %177 = vector.shape_cast %157 : vector<1x128xf32> to vector<1x1x128xf32>
    %178 = vector.broadcast %177 : vector<1x1x128xf32> to vector<4x8x128xf32>
    %179 = arith.addf %176, %178 : vector<4x8x128xf32>
    %180 = vector.shape_cast %179 : vector<4x8x128xf32> to vector<32x128xf32>
    %181 = arith.truncf %180 : vector<32x128xf32> to vector<32x128xbf16>
    %c0_49 = arith.constant 0 : index
    %c0_50 = arith.constant 0 : index
    %182 = vector.load %arg5[%c0_49, %c0_50] : memref<128x512xbf16, #tpu.memory_space<vmem>>, vector<128x512xbf16>
    %cst_51 = arith.constant dense<0.000000e+00> : vector<32x512xf32>
    %183 = tpu.matmul %181, %182, %cst_51 {dimension_numbers = #tpu.dot_dimension_numbers<[1], [0], [0], [1], [0, 0, 1, 1], [], []>} : vector<32x128xbf16>, vector<128x512xbf16>, vector<32x512xf32> -> vector<32x512xf32>
    %c0_52 = arith.constant 0 : index
    %c0_53 = arith.constant 0 : index
    %184 = vector.load %arg6[%c0_52, %c0_53] : memref<1x512xf32, #tpu.memory_space<vmem>>, vector<1x512xf32>
    %185 = vector.broadcast %184 : vector<1x512xf32> to vector<32x512xf32>
    %186 = arith.addf %183, %185 : vector<32x512xf32>
    %cst_54 = arith.constant 0.000000e+00 : f32
    %187 = vector.broadcast %cst_54 : f32 to vector<32x512xf32>
    %188 = arith.maximumf %186, %187 : vector<32x512xf32>
    %189 = arith.truncf %188 : vector<32x512xf32> to vector<32x512xbf16>
    %c0_55 = arith.constant 0 : index
    %c0_56 = arith.constant 0 : index
    %190 = vector.load %arg7[%c0_55, %c0_56] : memref<512x128xbf16, #tpu.memory_space<vmem>>, vector<512x128xbf16>
    %cst_57 = arith.constant dense<0.000000e+00> : vector<32x128xf32>
    %191 = tpu.matmul %189, %190, %cst_57 {dimension_numbers = #tpu.dot_dimension_numbers<[1], [0], [0], [1], [0, 0, 1, 1], [], []>} : vector<32x512xbf16>, vector<512x128xbf16>, vector<32x128xf32> -> vector<32x128xf32>
    %c0_58 = arith.constant 0 : index
    %c0_59 = arith.constant 0 : index
    %192 = vector.load %arg8[%c0_58, %c0_59] : memref<1x128xf32, #tpu.memory_space<vmem>>, vector<1x128xf32>
    %193 = vector.broadcast %192 : vector<1x128xf32> to vector<32x128xf32>
    %194 = arith.addf %191, %193 : vector<32x128xf32>
    %195 = vector.shape_cast %194 : vector<32x128xf32> to vector<4x8x128xf32>
    %196 = arith.addf %155, %195 : vector<4x8x128xf32>
    %c0_60 = arith.constant 0 : index
    %c0_61 = arith.constant 0 : index
    %c0_62 = arith.constant 0 : index
    %197 = vector.load %arg13[%c0_60, %c0_61, %c0_62] : memref<4x8x128xf32, #tpu.memory_space<vmem>>, vector<4x8x128xf32>
    tpu.vector_store %arg13[%c0_60, %c0_61, %c0_62], %196 {strides = array<i32>} : memref<4x8x128xf32, #tpu.memory_space<vmem>>, vector<4x8x128xf32>,
    return
  }
  func.func @transform_0(%arg0: i32) -> (i32, i32, i32) {
    %c0_i32 = arith.constant 0 : i32
    %c0_i32_0 = arith.constant 0 : i32
    %c0_i32_1 = arith.constant 0 : i32
    return %arg0, %c0_i32, %c0_i32_0 : i32, i32, i32
  }
  func.func @transform_1(%arg0: i32) -> (i32, i32) {
    %c0_i32 = arith.constant 0 : i32
    %c0_i32_0 = arith.constant 0 : i32
    %c0_i32_1 = arith.constant 0 : i32
    return %c0_i32, %c0_i32_0 : i32, i32
  }
  func.func @transform_2(%arg0: i32) -> (i32, i32) {
    %c0_i32 = arith.constant 0 : i32
    %c0_i32_0 = arith.constant 0 : i32
    %c0_i32_1 = arith.constant 0 : i32
    return %c0_i32, %c0_i32_0 : i32, i32
  }
  func.func @transform_3(%arg0: i32) -> (i32, i32) {
    %c0_i32 = arith.constant 0 : i32
    %c0_i32_0 = arith.constant 0 : i32
    %c0_i32_1 = arith.constant 0 : i32
    return %c0_i32, %c0_i32_0 : i32, i32
  }
  func.func @transform_4(%arg0: i32) -> (i32, i32) {
    %c0_i32 = arith.constant 0 : i32
    %c0_i32_0 = arith.constant 0 : i32
    %c0_i32_1 = arith.constant 0 : i32
    return %c0_i32, %c0_i32_0 : i32, i32
  }
  func.func @transform_5(%arg0: i32) -> (i32, i32) {
    %c0_i32 = arith.constant 0 : i32
    %c0_i32_0 = arith.constant 0 : i32
    %c0_i32_1 = arith.constant 0 : i32
    return %c0_i32, %c0_i32_0 : i32, i32
  }
  func.func @transform_6(%arg0: i32) -> (i32, i32) {
    %c0_i32 = arith.constant 0 : i32
    %c0_i32_0 = arith.constant 0 : i32
    %c0_i32_1 = arith.constant 0 : i32
    return %c0_i32, %c0_i32_0 : i32, i32
  }
  func.func @transform_7(%arg0: i32) -> (i32, i32) {
    %c0_i32 = arith.constant 0 : i32
    %c0_i32_0 = arith.constant 0 : i32
    %c0_i32_1 = arith.constant 0 : i32
    return %c0_i32, %c0_i32_0 : i32, i32
  }
  func.func @transform_8(%arg0: i32) -> (i32, i32) {
    %c0_i32 = arith.constant 0 : i32
    %c0_i32_0 = arith.constant 0 : i32
    %c0_i32_1 = arith.constant 0 : i32
    return %c0_i32, %c0_i32_0 : i32, i32
  }
  func.func @transform_9(%arg0: i32) -> (i32, i32) {
    %c0_i32 = arith.constant 0 : i32
    %c0_i32_0 = arith.constant 0 : i32
    %c0_i32_1 = arith.constant 0 : i32
    return %c0_i32, %c0_i32_0 : i32, i32
  }
  func.func @transform_10(%arg0: i32) -> (i32, i32) {
    %c0_i32 = arith.constant 0 : i32
    %c0_i32_0 = arith.constant 0 : i32
    %c0_i32_1 = arith.constant 0 : i32
    return %c0_i32, %c0_i32_0 : i32, i32
  }
  func.func @transform_11(%arg0: i32) -> (i32, i32) {
    %c0_i32 = arith.constant 0 : i32
    %c0_i32_0 = arith.constant 0 : i32
    %c0_i32_1 = arith.constant 0 : i32
    return %c0_i32, %c0_i32_0 : i32, i32
  }
  func.func @transform_12(%arg0: i32) -> (i32, i32, i32) {
    %c0_i32 = arith.constant 0 : i32
    %c0_i32_0 = arith.constant 0 : i32
    %c0_i32_1 = arith.constant 0 : i32
    return %arg0, %c0_i32, %c0_i32_0 : i32, i32, i32
  }
}

</mosaic_0001>

<bundles_post_ra>
// kernel: tpu_custom_call.1
= control target key start
LH: loop header
LB: loop body
LE: loop exit
PB: predicated region body
PF: predicated region fallthrough
CT: control target
= control target key end

     0   :  { %s4732_s0 = inlined_call_operand.hbm [shape: f32[8,8,128], index: 0, kind: input, shape index: {}]   ;;  %s4733_s1 = inlined_call_operand.hbm [shape: bf16[128,384], index: 1, kind: input, shape index: {}]   ;;  %s4734_s2 = inlined_call_operand.hbm [shape: bf16[128,128], index: 2, kind: input, shape index: {}]   ;;  %s4735_s3 = inlined_call_operand.hbm [shape: f32[1,128], index: 3, kind: input, shape index: {}]   ;;  %s4736_s4 = inlined_call_operand.hbm [shape: bf16[128,512], index: 4, kind: input, shape index: {}]   ;;  %s4737_s5 = inlined_call_operand.vmem [shape: f32[1,512], index: 5, kind: input, shape index: {}]   ;;  %s4738_s6 = inlined_call_operand.hbm [shape: bf16[512,128], index: 6, kind: input, shape index: {}]   ;;  %s4739_s7 = inlined_call_operand.vmem [shape: f32[1,128], index: 7, kind: input, shape index: {}]   ;;  %s4740_s8 = inlined_call_operand.vmem [shape: f32[1,128], index: 8, kind: input, shape index: {}]   ;;  %s4741_s9 = inlined_call_operand.vmem [shape: f32[1,128], index: 9, kind: input, shape index: {}]   ;;  %s4742_s10 = inlined_call_operand.vmem [shape: f32[1,128], index: 10, kind: input, shape index: {}]   ;;  %s4743_s11 = inlined_call_operand.vmem [shape: f32[1,128], index: 11, kind: input, shape index: {}]   ;;  %s4744_s12 = inlined_call_operand.hbm [shape: f32[8,8,128], index: 12, kind: output, shape index: {}]  }
   0x1   :  { %4746 = sst [smem:[#allocation20_spill]] %s4733_s1 }
   0x2   :  { %4747 = sst [smem:[#allocation21_spill]] %s4734_s2 }
   0x3   :  { %4748 = sst [smem:[#allocation22_spill]] %s4735_s3 }
   0x4   :  { %4749 = sst [smem:[#allocation23_spill]] %s4736_s4 }
   0x5   :  { %4750 = sst [smem:[#allocation24_spill]] %s4738_s6 }
   0x6   :  { %4751 = sst [smem:[#allocation25_spill]] %s4744_s12 }
   0x7   :  { %17 = vsyncpa [#allocation3], 0 }
   0x8   :  { %19 = vsyncpa [#allocation3 + $0x1], 0 }
   0x9   :  { %20 = vsyncpa [#allocation6], 0 }
   0xa   :  { %21 = vsyncpa [#allocation9], 0 }
   0xb   :  { %22 = vsyncpa [#allocation12], 0 }
   0xc   :  { %23 = vsyncpa [#allocation4], 0 }
   0xd   :  { %25 = vsyncpa [#allocation4 + $0x1], 0  ;;  %s4032_s21 = smov 0   ;;  %s4034_s22 = smov 0  }
   0xe   :  { %s4036_s23 = smov 0   ;;  %s4038_s24 = smov 0  }
   0xf LB: > { %s4752_s1 = sld [smem:[#allocation20_spill]]  ;;  %s4056_s28 = sadd.s32 4294967295, %s3945_s24   ;;  %s3945_s24 = sphi %s4038_s24, %s4779_s24   ;;  %s3941_s23 = sphi %s4036_s23, %s4778_s23   ;;  %s3937_s22 = sphi %s4034_s22, %s4777_s22   ;;  %s3933_s21 = sphi %s4032_s21, %s4776_s21  }
  0x10   : > { %p2914_p0 = scmp.ge.s32.totalorder %s3945_s24, 1  ;;  %p52_p1 = scmp.eq.s32.totalorder %s4056_s28, 0 }
  0x11   : > { %p319_p2 = scmp.lt.s32.totalorder %s3945_s24, 3  ;;  %s3947_s30 = smov [#allocation5]  }
  0x12   : > { %s332_s13 = sshll.u32 %s3947_s30, 4  ;;  %s4754_s3 = sld [smem:[#allocation22_spill]]  ;;  %s333_s13 = int_to_ptr.vmem [resolvable:$true] %s332_s13 }
  0x13   : > { %p4061_p3 = pnand %p2914_p0, %p319_p2  ;;  %s4756_s2 = sld [smem:[#allocation21_spill]] }
  0x14   : > { %s3948_s25 = smov [#allocation8]   ;;  %s3949_s30 = smov 192  }
  0x15   : > { %s330_s27 = sshll.u32 %s4752_s1, 4  ;;  %p3475_p4 = pneg %p4061_p3  ;;  %s331_s27 = int_to_ptr.hbm [resolvable:$true] %s330_s27 }
  0x16   : > { %s361_s26 = sshll.u32 %s3948_s25, 4  ;;  %s3950_s1 = smov 12   ;;  %s362_s26 = int_to_ptr.vmem [resolvable:$true] %s361_s26 }
  0x17   : > { %p4073_p6 = pnand %p3475_p4, %p52_p1  ;;  %s3951_s14 = smov [#allocation7]  }
  0x18   : > { %s359_s16 = sshll.u32 %s4754_s3, 4  ;;  %s346_s15 = sshll.u32 %s3951_s14, 4  ;;  %s360_s16 = int_to_ptr.hbm [resolvable:$true] %s359_s16  ;;  %s347_s15 = int_to_ptr.vmem [resolvable:$true] %s346_s15 }
  0x19   : > { %s344_s20 = sshll.u32 %s4756_s2, 4  ;;  %s4757_s4 = sld [smem:[#allocation23_spill]]  ;;  %s345_s20 = int_to_ptr.hbm [resolvable:$true] %s344_s20 }
  0x1a   : > { %3478 = dma.hbm_to_vmem [thread:$0]  (!%p4073_p6), %s331_s27, 3072, %s333_s13, [#allocation6], %s3949_s30, %s3949_s30, %s3950_s1  }
  0x1b   : > { %3484 = dma.hbm_to_vmem [thread:$0]  (!%p4073_p6), %s360_s16, 16, %s362_s26, [#allocation9]  }
  0x1c   : > { %s3952_s19 = smov 64   ;;  %s3953_s25 = smov 4  }
  0x1d   : > { %3481 = dma.hbm_to_vmem [thread:$0]  (!%p4073_p6), %s345_s20, 1024, %s347_s15, [#allocation6], %s3952_s19, %s3952_s19, %s3953_s25  }
  0x1e   : > { %s3954_s1 = smov [#allocation10]   ;;  %s3955_s13 = smov 256  }
  0x1f   : > { %s370_s18 = sshll.u32 %s4757_s4, 4  ;;  %s372_s27 = sshll.u32 %s3954_s1, 4  ;;  %s371_s18 = int_to_ptr.hbm [resolvable:$true] %s370_s18  ;;  %s373_s27 = int_to_ptr.vmem [resolvable:$true] %s372_s27 }
  0x20   : > { %s3956_s3 = smov 16   ;;  %s4758_s6 = sld [smem:[#allocation24_spill]] }
  0x21   : > { %3487 = dma.hbm_to_vmem [thread:$0]  (!%p4073_p6), %s371_s18, 4096, %s373_s27, [#allocation9], %s3955_s13, %s3955_s13, %s3956_s3  }
  0x22   : > { %s3957_s26 = smov [#allocation11]   ;;  %s2913_s14 = sadd.s32 4294967294, %s3945_s24  }
  0x23   : > { %s389_s30 = sshll.u32 %s3957_s26, 4  ;;  %s4098_s15 = sadd.s32 1, %s3945_s24   ;;  %s390_s30 = int_to_ptr.vmem [resolvable:$true] %s389_s30 }
  0x24   : > { %s38_s1 = sadd.s32 1, %s3941_s23  ;;  %s35_s18 = ssub.s32 %s3945_s24, %s4098_s15 }
  0x25   : > { %p45_p7 = scmp.ne.s32.totalorder %s3941_s23, %s3937_s22  ;;  %p36_p8 = scmp.eq.s32.totalorder %s35_s18, 0 }
  0x26   : > { %s387_s20 = sshll.u32 %s4758_s6, 4  ;;  %p46_p9 = scmp.eq.s32.totalorder %s3945_s24, 0  ;;  %s388_s20 = int_to_ptr.hbm [resolvable:$true] %s387_s20 }
  0x27   : > { %3490 = dma.hbm_to_vmem [thread:$0]  (!%p4073_p6), %s388_s20, 4096, %s390_s30, [#allocation12], %s3952_s19, %s3952_s19, %s3953_s25  }
  0x28   : > { %p51_p10 = scmp.ne.s32.totalorder %s3937_s22, %s3933_s21  ;;  %p306_p11 = scmp.eq.s32.totalorder %s4056_s28, 1 }
  0x29   : > { %s4110_s27 = scalar_select %p36_p8, %s3941_s23, %s38_s1  }
  0x2a   : > { %p4112_p12 = por %p46_p9, %p45_p7  ;;  %p4118_p13 = por %p52_p1, %p51_p10 }
  0x2b   : > { %4759 = sst [smem:[#allocation19_spill]] %s4110_s27  ;;  %p4122_p0 = por %p306_p11, %p45_p7 }
  0x2c   : > { %p312_p2 = scmp.eq.s32.totalorder %s2913_s14, 1  ;;  %p3504_p4 = scmp.lt.s32.totalorder %s3945_s24, 2 }
  0x2d   : > { %s418_s25 = sand.u32 1, %s3941_s23   ;;  %s3353_s16 = sshll.u32 %s3945_s24, 5 }
  0x2e   : > { %p4128_p6 = por %p312_p2, %p51_p10  ;;  %s2921_s12 = sshll.u32 %s418_s25, 5 }
  0x2f   : > { %s427_s30 = scalar_lea.hbm %s4732_s0, %s3353_s16  ;;  %s422_s18 = scalar_lea.vmem [#allocation2], %s2921_s12 }
  0x30   : > { %s428_s1 = sshll.u32 %s427_s30, 4  ;;  %s430_s2 = sshll.u32 %s422_s18, 4  ;;  %s429_s1 = int_to_ptr.hbm [resolvable:$true] %s428_s1  ;;  %s431_s2 = int_to_ptr.vmem [resolvable:$true] %s430_s2 }
  0x31   : > { %p4138_p7 = pnand %p3504_p4, %p4112_p12  ;;  %s419_s4 = scalar_lea.sflag [#allocation3], %s418_s25 }
  0x32   : > { %s3837_s6 = sshra.s32 %s429_s1, 4  ;;  %s3844_s20 = scalar_lea.hbm %s4732_s0, 64  ;;  %s3838_s6 = int_to_ptr.hbm [resolvable:$true] %s3837_s6 }
  0x33   : > { %s3839_s27 = scalar_lea.hbm %s3838_s6, 32  ;;  %p3841_p9 = pneg %p4138_p7 }
  0x34   : > { %p3840_p8 = scmp.ne.s32.totalorder %s3838_s6, %s3839_s27  ;;  %p3845_p12 = scmp.lt.s32.totalorder %s3838_s6, %s4732_s0 }
  0x35   : > { %p3846_p2 = scmp.lt.s32.totalorder %s3844_s20, %s3839_s27 }
  0x36   : > { %p3842_p10 = pnand %p3841_p9, %p3840_p8 }
  0x37   : > { %p3847_p4 = por %p3846_p2, %p3845_p12 }
  0x38   : > { %p3843_p11 = pneg %p3842_p10 }
  0x3a   : > { %p3848_p5 = pnand %p3847_p4, %p3843_p11 }
  0x3c   : > { %3851 = shalt.err (!%p3848_p5)
}
  0x3d   : > { %s3958_s25 = smov 128   ;;  %s3959_s30 = smov 8  }
  0x3e   : > { %3494 = dma.hbm_to_vmem [thread:$0]  (!%p4138_p7), %s429_s1, 512, %s431_s2, %s419_s4, %s3958_s25, %s3958_s25, %s3959_s30  }
  0x3f   : > { %442 = sbr.rel (%p4061_p3) target bundleno = 2805 (0xaf5), region = 68  ;;  %s4155_s18 = sand.u32 (!%p4061_p3), 1, %s3937_s22  }
  0x40   : > { %s2925_s6 = sshll.u32 (!%p4061_p3), %s4155_s18, 5  ;;  %s445_s27 = scalar_lea.sflag (!%p4061_p3), [#allocation3], %s4155_s18 }
  0x41   : > { %s4161_s16 = scalar_lea.vmem (!%p4061_p3), [#allocation2], %s2925_s6 }
  0x44   : > { %3912 = dma.done.wait (%p4118_p13), %s445_s27, 512  }
  0x45   : > { %3914 = vsyncadd (%p4118_p13), %s445_s27, 4294966784 }
  0x46   : > { %3916 = dma.done.wait (%p52_p1), [#allocation6], 4096  }
  0x47   : > { %3918 = vsyncadd (%p52_p1), [#allocation6], 4294963200 }
  0x48   : > { %3920 = dma.done.wait (%p52_p1), [#allocation9], 4112  }
  0x49   : > { %3922 = vsyncadd (%p52_p1), [#allocation9], 4294963184 }
  0x4a   : > { %3924 = dma.done.wait (%p52_p1), [#allocation12], 4096  }
  0x4b   : > { %3926 = vsyncadd (%p52_p1), [#allocation12], 4294963200  ;;  %v3018_v0 = vld [vmem:[#allocation5 + $0xa8] sm:$0xf]  ;;  %v3376_v1 = vld [vmem:[#allocation5 + $0xb0] sm:$0xf0] }
  0x4c   : > { %v3375_v2 = vld [vmem:[#allocation5 + $0xac] sm:$0xf]  ;;  %v3019_v3 = vor.u32 %v3376_v1, %v3018_v0  ;;  %v3020_v4 = vld [vmem:[#allocation5 + $0xb4] sm:$0xf0]  ;;  %v3006_v5 = vld [vmem:[#allocation5 + $0x90] sm:$0xf] }
  0x4d   : > { %v3373_v6 = vld [vmem:[#allocation5 + $0x98] sm:$0xf0]  ;;  %v3960_v7 = vmov 8.0   ;;  %v3023_v8 = vor.u32 %v3375_v2, %v3020_v4  ;;  %v3372_v9 = vld [vmem:[#allocation5 + $0x94] sm:$0xf]  ;;  %v4180_v26 = vld [vmem:[%s4161_s16] sm:$0xff] }
  0x4e   : > { %3599 = vrcp.f32 %v3960_v7  ;;  %v3008_v10 = vld [vmem:[#allocation5 + $0x9c] sm:$0xf0]  ;;  %826 = vmatpush.bf16.msra.mxu0 %v3019_v3  ;;  %v3007_v11 = vor.u32 %v3373_v6, %v3006_v5  ;;  %v2994_v13 = vld [vmem:[#allocation5 + $0x78] sm:$0xf]  ;;  %v3370_v14 = vld [vmem:[#allocation5 + $0x80] sm:$0xf0] }
  0x4f   : > { %845 = vmatpush.bf16.msra.mxu1 %v3023_v8  ;;  %v3011_v12 = vor.u32 %v3372_v9, %v3008_v10  ;;  %v3369_v15 = vld [vmem:[#allocation5 + $0x7c] sm:$0xf]  ;;  %v2996_v16 = vld [vmem:[#allocation5 + $0x84] sm:$0xf0]  ;;  %v2995_v18 = vor.u32 %v3370_v14, %v2994_v13  ;;  %v2982_v20 = vld [vmem:[#allocation5 + $0x60] sm:$0xf] }
  0x50   : > { %v2999_v19 = vor.u32 %v3369_v15, %v2996_v16  ;;  %v3367_v21 = vld [vmem:[#allocation5 + $0x68] sm:$0xf0]  ;;  %v3366_v22 = vld [vmem:[#allocation5 + $0x64] sm:$0xf]  ;;  %v2984_v23 = vld [vmem:[#allocation5 + $0x6c] sm:$0xf0] }
  0x51   : > { %v2970_v24 = vld [vmem:[#allocation5 + $0x48] sm:$0xf]  ;;  %v3364_v25 = vld [vmem:[#allocation5 + $0x50] sm:$0xf0]  ;;  %v2983_v28 = vor.u32 %v3367_v21, %v2982_v20  ;;  %v3363_v29 = vld [vmem:[#allocation5 + $0x4c] sm:$0xf]  ;;  %v2987_v32 = vor.u32 %v3366_v22, %v2984_v23 }
  0x52   : > { %827 = vmatpush.bf16.msra.mxu0 %v3007_v11  ;;  %v4183_v30 = vld [vmem:[%s4161_s16 + $0x8] sm:$0xff]  ;;  %v524_v31 = vrot.slane %v4180_v26, 4  ;;  %v2972_v33 = vld [vmem:[#allocation5 + $0x54] sm:$0xf0]  ;;  %v4188_v36 = vld [vmem:[%s4161_s16 + $0x10] sm:$0xff]  ;;  %v3961_v39 = vmov 7.0   ;;  %v2971_v44 = vor.u32 %v3364_v25, %v2970_v24 }
  0x53   : > { %846 = vmatpush.bf16.msra.mxu1 %v3011_v12  ;;  %v530_v34 = vrot.slane %v4183_v30, 4  ;;  %v4191_v37 = vld [vmem:[%s4161_s16 + $0x18] sm:$0xff]  ;;  %3601 = vrcp.f32 %v3961_v39  ;;  %v536_v40 = vrot.slane %v4188_v36, 4  ;;  %v2975_v48 = vor.u32 %v3363_v29, %v2972_v33  ;;  %v2958_v49 = vld [vmem:[#allocation5 + $0x30] sm:$0xf]  ;;  %s3962_s1 = smov 96  }
  0x54   : > { %v3600_v17 = vpop.eup %3599  ;;  %v525_v38 = vadd.f32 %v524_v31, %v4180_v26  ;;  %v542_v41 = vrot.slane %v4191_v37, 4  ;;  %v3361_v50 = vld [vmem:[#allocation5 + $0x38] sm:$0xf0]  ;;  %v3360_v53 = vld [vmem:[#allocation5 + $0x34] sm:$0xf]  ;;  %vm896_vm14 = vcmask 261120  }
  0x55   : > { %v549_v27 = vmul.f32 8.0, %v3600_v17  ;;  %v531_v42 = vadd.f32 %v530_v34, %v4183_v30  ;;  %v537_v46 = vadd.f32 %v536_v40, %v4188_v36  ;;  %v2960_v54 = vld [vmem:[#allocation5 + $0x3c] sm:$0xf0]  ;;  %vm553_vm0 = vweird.f32 %v3600_v17  ;;  %v2946_v1 = vld [vmem:[#allocation5 + $0x18] sm:$0xf]  ;;  %s3963_s14 = smov 64  }
  0x56   : > { %828 = vmatpush.bf16.msra.mxu0 %v2995_v18  ;;  %v526_v45 = vrot.slane %v525_v38, 2  ;;  %v543_v47 = vadd.f32 %v542_v41, %v4191_v37  ;;  %v2959_v60 = vor.u32 %v3361_v50, %v2958_v49  ;;  %v2963_v0 = vor.u32 %v3360_v53, %v2960_v54  ;;  %v3358_v2 = vld [vmem:[#allocation5 + $0x20] sm:$0xf0]  ;;  %v3357_v5 = vld [vmem:[#allocation5 + $0x1c] sm:$0xf]  ;;  %s3964_s12 = smov 32  }
  0x57   : > { %847 = vmatpush.bf16.msra.mxu1 %v2999_v19  ;;  %v550_v35 = vsub.f32 1.0, %v549_v27  ;;  %v532_v51 = vrot.slane %v531_v42, 2  ;;  %v538_v56 = vrot.slane %v537_v46, 2  ;;  %v2948_v6 = vld [vmem:[#allocation5 + $0x24] sm:$0xf0]  ;;  %v2947_v12 = vor.u32 %v3358_v2, %v2946_v1  ;;  %s4689_s4 = scalar_lea.vmem [#allocation13], %s2925_s6 }
  0x58   : > { %v527_v55 = vadd.f32 %v526_v45, %v525_v38  ;;  %v544_v57 = vrot.slane %v543_v47, 2  ;;  %v2951_v16 = vor.u32 %v3357_v5, %v2948_v6  ;;  %v2934_v18 = vld [vmem:[#allocation5] sm:$0xf]  ;;  %v3355_v19 = vld [vmem:[#allocation5 + $0x8] sm:$0xf0]  ;;  %vm1039_vm15 = vcmask 1043456  }
  0x59   : > { %v551_v43 = vmul.f32 %v3600_v17, %v550_v35  ;;  %v533_v58 = vadd.f32 %v532_v51, %v531_v42  ;;  %v4199_v59 = vpop.eup %3601  ;;  %v539_v62 = vadd.f32 %v538_v56, %v537_v46  ;;  %v3354_v20 = vld [vmem:[#allocation5 + $0x4] sm:$0xf]  ;;  %v2936_v21 = vld [vmem:[#allocation5 + $0xc] sm:$0xf0]  ;;  %s3450_s6 = sshll.u32 %s4056_s28, 5  ;;  %s2777_s28 = scalar_lea.sflag [#allocation4], %s4155_s18 }
  0x5a   : > { %829 = vmatpush.bf16.msra.mxu0 %v2983_v28  ;;  %v528_v61 = vrot.slane %v527_v55, 1  ;;  %v545_v63 = vadd.f32 %v544_v57, %v543_v47  ;;  %v592_v11 = vmul.f32 7.0, %v4199_v59  ;;  %v2935_v28 = vor.u32 %v3355_v19, %v2934_v18 }
  0x5b   : > { %848 = vmatpush.bf16.msra.mxu1 %v2987_v32  ;;  %v552_v52 = vadd.f32 %v3600_v17, %v551_v43  ;;  %v534_v3 = vrot.slane %v533_v58, 1  ;;  %v540_v8 = vrot.slane %v539_v62, 1  ;;  %vm596_vm1 = vweird.f32 %v4199_v59 }
  0x5c   : > { %v529_v7 = vadd.f32 %v528_v61, %v527_v55  ;;  %v546_v9 = vrot.slane %v545_v63, 1  ;;  %v593_v27 = vsub.f32 1.0, %v592_v11 }
  0x5d   : > { %v4201_v4 = vsel %vm553_vm0, %v3600_v17, %v552_v52  ;;  %v535_v10 = vadd.f32 %v534_v3, %v533_v58  ;;  %v541_v14 = vadd.f32 %v540_v8, %v539_v62 }
  0x5e   : > { %830 = vmatpush.bf16.msra.mxu0 %v2971_v44  ;;  %v555_v13 = vmul.f32 %v4201_v4, %v529_v7  ;;  %v547_v15 = vadd.f32 %v546_v9, %v545_v63  ;;  %v594_v39 = vmul.f32 %v4199_v59, %v593_v27  ;;  %v3014_v27 = vld [vmem:[#allocation5 + $0x98] sm:$0xf] }
  0x5f   : > { %849 = vmatpush.bf16.msra.mxu1 %v2975_v48  ;;  %v556_v17 = vmul.f32 %v4201_v4, %v535_v10  ;;  %v557_v23 = vmul.f32 %v4201_v4, %v541_v14 }
  0x60   : > { %v4207_v22 = vsub.f32 %v4180_v26, %v555_v13  ;;  %v558_v24 = vmul.f32 %v4201_v4, %v547_v15  ;;  %v2939_v26 = vor.u32 %v3354_v20, %v2936_v21  ;;  %v595_v46 = vadd.f32 %v4199_v59, %v594_v39  ;;  %v3377_v20 = vld [vmem:[#allocation5 + $0xb8] sm:$0xf0] }
  0x61   : > { %v4212_v25 = vsub.f32 %v4183_v30, %v556_v17  ;;  %v4217_v31 = vsub.f32 %v4188_v36, %v557_v23  ;;  %v3026_v17 = vld [vmem:[#allocation5 + $0xb0] sm:$0xf] }
  0x62   : > { %831 = vmatpush.bf16.msra.mxu0 %v2959_v60  ;;  %v563_v29 = vmul.f32 %v4207_v22, %v4207_v22  ;;  %v4220_v32 = vsub.f32 %v4191_v37, %v558_v24  ;;  %v4232_v55 = vsel %vm596_vm1, %v4199_v59, %v595_v46  ;;  %v3027_v24 = vor.u32 %v3377_v20, %v3026_v17 }
  0x63   : > { %850 = vmatpush.bf16.msra.mxu1 %v2963_v0  ;;  %v564_v33 = vmul.f32 %v4212_v25, %v4212_v25  ;;  %v565_v30 = vmul.f32 %v4217_v31, %v4217_v31  ;;  %vm983_vm1 = vcmask 64512  }
  0x64   : > { %v567_v34 = vrot.slane %v563_v29, 4  ;;  %v566_v35 = vmul.f32 %v4220_v32, %v4220_v32  ;;  %864 = vmatpush.bf16.msra.mxu2 %v3027_v24 }
  0x65   : > { %v573_v38 = vrot.slane %v564_v33, 4  ;;  %v579_v40 = vrot.slane %v565_v30, 4 }
  0x66   : > { %832 = vmatpush.bf16.msra.mxu0 %v2947_v12  ;;  %v568_v36 = vadd.f32 %v567_v34, %v563_v29  ;;  %v585_v37 = vrot.slane %v566_v35, 4 }
  0x67   : > { %851 = vmatpush.bf16.msra.mxu1 %v2951_v16  ;;  %v574_v41 = vadd.f32 %v573_v38, %v564_v33  ;;  %v580_v43 = vadd.f32 %v579_v40, %v565_v30  ;;  %v3371_v40 = vld [vmem:[#allocation5 + $0x88] sm:$0xf0] }
  0x68   : > { %v569_v42 = vrot.slane %v568_v36, 2  ;;  %v586_v44 = vadd.f32 %v585_v37, %v566_v35 }
  0x69   : > { %v575_v45 = vrot.slane %v574_v41, 2  ;;  %v581_v48 = vrot.slane %v580_v43, 2 }
  0x6a   : > { %833 = vmatpush.bf16.msra.mxu0 %v2935_v28  ;;  %v570_v47 = vadd.f32 %v569_v42, %v568_v36  ;;  %v587_v49 = vrot.slane %v586_v44, 2  ;;  %v3374_v28 = vld [vmem:[#allocation5 + $0xa0] sm:$0xf0]  ;;  %v3002_v36 = vld [vmem:[#allocation5 + $0x80] sm:$0xf] }
  0x6b   : > { %852 = vmatpush.bf16.msra.mxu1 %v2939_v26  ;;  %v576_v50 = vadd.f32 %v575_v45, %v574_v41  ;;  %v582_v52 = vadd.f32 %v581_v48, %v580_v43  ;;  %v3015_v35 = vor.u32 %v3374_v28, %v3014_v27  ;;  %v3593_v41 = vld [vmem:[%s4740_s8] ss:$0 sm:$0xff]  ;;  %v3003_v48 = vor.u32 %v3371_v40, %v3002_v36 }
  0x6c   : > { %v571_v51 = vrot.slane %v570_v47, 1  ;;  %v588_v53 = vadd.f32 %v587_v49, %v586_v44 }
  0x6d   : > { %v577_v54 = vrot.slane %v576_v50, 1  ;;  %v583_v57 = vrot.slane %v582_v52, 1  ;;  %865 = vmatpush.bf16.msra.mxu2 %v3015_v35 }
  0x6e   : > { %v572_v56 = vadd.f32 %v571_v51, %v570_v47  ;;  %v589_v58 = vrot.slane %v588_v53, 1  ;;  %v3594_v47 = vld [vmem:[%s4741_s9] ss:$0 sm:$0xff]  ;;  %v3368_v51 = vld [vmem:[#allocation5 + $0x70] sm:$0xf0] }
  0x6f   : > { %v578_v60 = vadd.f32 %v577_v54, %v576_v50  ;;  %v584_v62 = vadd.f32 %v583_v57, %v582_v52  ;;  %v2990_v50 = vld [vmem:[#allocation5 + $0x68] sm:$0xf] }
  0x70   : > { %v598_v61 = vmul.f32 %v4232_v55, %v572_v56  ;;  %v590_v63 = vadd.f32 %v589_v58, %v588_v53  ;;  %v2991_v58 = vor.u32 %v3368_v51, %v2990_v50 }
  0x71   : > { %v599_v0 = vmul.f32 %v4232_v55, %v578_v60  ;;  %v600_v2 = vmul.f32 %v4232_v55, %v584_v62  ;;  %866 = vmatpush.bf16.msra.mxu2 %v3003_v48 }
  0x72   : > { %v602_v1 = vadd.f32 1e-05, %v598_v61  ;;  %v601_v3 = vmul.f32 %v4232_v55, %v590_v63  ;;  %v2978_v61 = vld [vmem:[#allocation5 + $0x50] sm:$0xf] }
  0x73   : > { %v603_v5 = vadd.f32 1e-05, %v599_v0  ;;  %v604_v6 = vadd.f32 1e-05, %v600_v2 }
  0x74   : > { %3603 = vrsqrt.f32 %v602_v1  ;;  %v605_v59 = vadd.f32 1e-05, %v601_v3  ;;  %vm612_vm2 = vweird.f32 %v602_v1 }
  0x75   : > { %3605 = vrsqrt.f32 %v603_v5  ;;  %vm622_vm4 = vweird.f32 %v603_v5  ;;  %vm632_vm8 = vweird.f32 %v604_v6  ;;  %867 = vmatpush.bf16.msra.mxu2 %v2991_v58 }
  0x76   : > { %3607 = vrsqrt.f32 %v604_v6  ;;  %vm642_vm10 = vweird.f32 %v605_v59 }
  0x77   : > { %3609 = vrsqrt.f32 %v605_v59 }
  0x7a   : > { %v3604_v7 = vpop.eup %3603 }
  0x7b   : > { %v3606_v8 = vpop.eup %3605  ;;  %v607_v9 = vmul.f32 %v3604_v7, %v602_v1  ;;  %vm613_vm3 = vweird.f32 %v3604_v7 }
  0x7c   : > { %v4238_v10 = vpop.eup %3607  ;;  %v617_v11 = vmul.f32 %v3606_v8, %v603_v5  ;;  %vm623_vm5 = vweird.f32 %v3606_v8  ;;  %vm4247_vm6 = vmor %vm612_vm2, %vm613_vm3  ;;  %v2966_v5 = vld [vmem:[#allocation5 + $0x38] sm:$0xf]  ;;  %vm1897_vm2 = vcmask 523264   ;;  %vm1902_vm3 = vcmask 785408  }
  0x7d   : > { %v4240_v12 = vpop.eup %3609  ;;  %v608_v13 = vmul.f32 %v3604_v7, %v607_v9  ;;  %v627_v14 = vmul.f32 %v4238_v10, %v604_v6  ;;  %vm4252_vm7 = vmor %vm622_vm4, %vm623_vm5  ;;  %vm633_vm9 = vweird.f32 %v4238_v10  ;;  %v3362_v6 = vld [vmem:[#allocation5 + $0x40] sm:$0xf0] }
  0x7e   : > { %v618_v15 = vmul.f32 %v3606_v8, %v617_v11  ;;  %v637_v16 = vmul.f32 %v4240_v12, %v605_v59  ;;  %vm643_vm11 = vweird.f32 %v4240_v12  ;;  %vm4271_vm12 = vmor %vm632_vm8, %vm633_vm9  ;;  %v2967_v59 = vor.u32 %v3362_v6, %v2966_v5 }
  0x7f   : > { %v609_v18 = vmul.f32 0.5, %v608_v13  ;;  %v628_v19 = vmul.f32 %v4238_v10, %v627_v14  ;;  %vm644_vm13 = vmor %vm642_vm10, %vm643_vm11  ;;  %v3359_v13 = vld [vmem:[#allocation5 + $0x28] sm:$0xf0] }
  0x80   : > { %v619_v21 = vmul.f32 0.5, %v618_v15  ;;  %v638_v23 = vmul.f32 %v4240_v12, %v637_v16  ;;  %v2942_v15 = vld [vmem:[#allocation5 + $0x8] sm:$0xf] }
  0x81   : > { %v610_v29 = vsub.f32 1.5, %v609_v18  ;;  %v629_v26 = vmul.f32 0.5, %v628_v19 }
  0x82   : > { %v620_v34 = vsub.f32 1.5, %v619_v21  ;;  %v639_v30 = vmul.f32 0.5, %v638_v23 }
  0x83   : > { %v611_v38 = vmul.f32 %v3604_v7, %v610_v29  ;;  %v630_v42 = vsub.f32 1.5, %v629_v26 }
  0x84   : > { %v621_v37 = vmul.f32 %v3606_v8, %v620_v34  ;;  %v640_v43 = vsub.f32 1.5, %v639_v30 }
  0x85   : > { %v615_v44 = vsel %vm4247_vm6, %v3604_v7, %v611_v38  ;;  %v631_v53 = vmul.f32 %v4238_v10, %v630_v42 }
  0x86   : > { %v625_v45 = vsel %vm4252_vm7, %v3606_v8, %v621_v37  ;;  %v646_v46 = vmul.f32 %v615_v44, %v4207_v22  ;;  %v641_v22 = vmul.f32 %v4240_v12, %v640_v43 }
  0x87   : > { %v647_v49 = vmul.f32 %v625_v45, %v4212_v25  ;;  %v3365_v25 = vld [vmem:[#allocation5 + $0x58] sm:$0xf0]  ;;  %v635_v62 = vsel %vm4271_vm12, %v4238_v10, %v631_v53  ;;  %v883_v53 = vlaneseq }
  0x88   : > { %v653_v52 = vmul.f32 %v3593_v41, %v646_v46  ;;  %v645_v63 = vsel %vm644_vm13, %v4240_v12, %v641_v22  ;;  %v2979_v1 = vor.u32 %v3365_v25, %v2978_v61  ;;  %v648_v2 = vmul.f32 %v635_v62, %v4217_v31  ;;  %v2954_v12 = vld [vmem:[#allocation5 + $0x20] sm:$0xf]  ;;  %v3356_v31 = vld [vmem:[#allocation5 + $0x10] sm:$0xf0] }
  0x89   : > { %v654_v56 = vmul.f32 %v3593_v41, %v647_v49  ;;  %v649_v3 = vmul.f32 %v645_v63, %v4220_v32  ;;  %v2955_v14 = vor.u32 %v3359_v13, %v2954_v12  ;;  %v2943_v16 = vor.u32 %v3356_v31, %v2942_v15 }
  0x8a   : > { %v660_v57 = vadd.f32 %v3594_v47, %v653_v52  ;;  %868 = vmatpush.bf16.msra.mxu2 %v2979_v1  ;;  %v655_v7 = vmul.f32 %v3593_v41, %v648_v2  ;;  %v884_v54 = vshrl.u32 %v883_v53, 7  ;;  %v886_v22 = vand.u32 127, %v883_v53 }
  0x8b   : > { %v661_v60 = vadd.f32 %v3594_v47, %v654_v56  ;;  %v656_v8 = vmul.f32 %v3593_v41, %v649_v3 }
  0x8c   : > { %v662_v9 = vadd.f32 %v3594_v47, %v655_v7  ;;  %vm4324_vm0 = vcmp.ge.s32.totalorder %v884_v54, %v886_v22 }
  0x8d   : > { %v664_v0 = vpack.c.bf16 %v661_v60, %v660_v57  ;;  %v663_v10 = vadd.f32 %v3594_v47, %v656_v8 }
  0x8e   : > { %869 = vmatpush.bf16.msra.mxu2 %v2967_v59 }
  0x8f   : > { %834 = vmatmul.bf16.vlgmr.msra.gmra.mxu0 %v664_v0  ;;  %853 = vmatmul.bf16.vlgmr.msra.gmra.mxu1 %v664_v0  ;;  %v665_v11 = vpack.c.bf16 %v663_v10, %v662_v9 }
  0x92   : > { %870 = vmatpush.bf16.msra.mxu2 %v2955_v14 }
  0x96   : > { %871 = vmatpush.bf16.msra.mxu2 %v2943_v16 }
  0x99   : > { %872 = vmatmul.bf16.vlgmr.msra.gmra.mxu2 %v664_v0 }
  0x9f   : > { %858 = vmatmul.bf16.gmra.mxu1 %v665_v11  ;;  %839 = vmatmul.bf16.gmra.mxu0 %v665_v11 }
  0xa9   : > { %877 = vmatmul.bf16.gmra.mxu2 %v665_v11 }
 0x10c   : > { %v854_v32 = vpop.f32.mrf.mxu1  ;;  %v835_v17 = vpop.f32.mrf.mxu0 }
 0x10d   : > { %v4283_v18 = vpack.c.bf16 %v854_v32, %v854_v32  ;;  %v4287_v20 = vpack.c.bf16 %v835_v17, %v835_v17 }
 0x10f   : > { %v901_v19 = vsel %vm896_vm14, %v4283_v18, 0  ;;  %v1119_v17 = vunpack.c.l.b16 %v4283_v18 }
 0x110   : > { %910 = vmatpush.bf16.xpose.msra.mxu3 %v901_v19 }
 0x114   : > { %v856_v21 = vpop.f32.mrf.mxu1  ;;  %v837_v34 = vpop.f32.mrf.mxu0 }
 0x115   : > { %v893_v23 = vpack.c.bf16 %v856_v21, %v856_v21  ;;  %v4297_v35 = vpack.c.bf16 %v837_v34, %v837_v34  ;;  %v4350_v21 = vpack.c.b16 %v1119_v17, %v1119_v17 }
 0x117   : > { %3028 = vmatmul.msk.bf16.vlgmr.msra.gmra.mxu3 %vm896_vm14, %v4287_v20  ;;  %v920_v24 = vsel %vm896_vm14, %v893_v23, 0  ;;  %v1148_v38 = vunpack.c.l.b16 %v893_v23 }
 0x118   : > { %929 = vmatpush.bf16.xpose.msrb.mxu3 %v920_v24 }
 0x119   : > { %v4302_v37 = vpack.c.b16 %v1148_v38, %v1148_v38 }
 0x11c   : > { %v859_v27 = vpop.f32.mrf.mxu1  ;;  %v840_v42 = vpop.f32.mrf.mxu0 }
 0x11d   : > { %v894_v28 = vpack.c.bf16 %v859_v27, %v859_v27  ;;  %v890_v43 = vpack.c.bf16 %v840_v42, %v840_v42  ;;  %v4315_v46 = vpop.f32.mrf.mxu2 }
 0x11e   : > { %v1032_v53 = vpack.c.bf16 %v4315_v46, %v4315_v46 }
 0x11f   : > { %v939_v29 = vsel %vm896_vm14, %v894_v28, 0  ;;  %v1177_v26 = vunpack.c.l.b16 %v894_v28  ;;  %v1172_v15 = vunpack.c.l.b16 %v890_v43 }
 0x120   : > { %948 = vmatpush.bf16.xpose.msra.mxu3 %v939_v29  ;;  %v1286_v54 = vunpack.c.l.b16 %v1032_v53 }
 0x121   : > { %v4293_v33 = vpack.c.b16 %v1177_v26, %v1177_v26  ;;  %v4345_v32 = vpack.c.b16 %v1172_v15, %v1172_v15 }
 0x122   : > { %v4364_v22 = vpack.c.b16 %v1286_v54, %v1286_v54 }
 0x123   : > { %1179 = vrot.lane.b32.xlu2 %v4293_v33, %s3962_s1 }
 0x124   : > { %v861_v30 = vpop.f32.mrf.mxu1  ;;  %v842_v44 = vpop.f32.mrf.mxu0 }
 0x125   : > { %v895_v39 = vpack.c.bf16 %v861_v30, %v861_v30  ;;  %v4311_v45 = vpack.c.bf16 %v842_v44, %v842_v44  ;;  %v4317_v47 = vpop.f32.mrf.mxu2  ;;  %v1114_v44 = vunpack.c.l.b16 %v4287_v20 }
 0x127   : > { %3029 = vmatmul.msk.bf16.vlgmr.msrb.gmra.mxu3 %vm896_vm14, %v4297_v35  ;;  %v1206_v36 = vunpack.c.l.b16 %v895_v39  ;;  %v958_v40 = vsel %vm896_vm14, %v895_v39, 0  ;;  %v1201_v20 = vunpack.c.l.b16 %v4311_v45 }
 0x128   : > { %967 = vmatpush.bf16.xpose.msrb.mxu3 %v958_v40 }
 0x129   : > { %v4304_v41 = vpack.c.b16 %v1206_v36, %v1206_v36 }
 0x12b   : > { %1150 = vrot.lane.b32.xlu2 %v4302_v37, %s3962_s1  ;;  %1208 = vrot.lane.b32.xlu0 %v4304_v41, %s3962_s1 }
 0x12d   : > { %v878_v48 = vpop.f32.mrf.mxu2 }
 0x12e   : > { %v4319_v50 = vpack.c.bf16 %v878_v48, %v878_v48 }
 0x130   : > { %v1079_v52 = vsel %vm1039_vm15, %v4319_v50, 0 }
 0x131   : > { %1088 = vmatpush.bf16.msrb.mxu2 %v1079_v52  ;;  %v4358_v52 = vpack.c.b16 %v1114_v44, %v1114_v44  ;;  %v1334_v44 = vunpack.c.l.b16 %v4319_v50 }
 0x135   : > { %v880_v60 = vpop.f32.mrf.mxu2 }
 0x136   : > { %v4328_v61 = vpack.c.bf16 %v880_v60, %v880_v60  ;;  %v4370_v60 = vpack.c.b16 %v1201_v20, %v1201_v20 }
 0x137   : > { %3030 = vmatmul.msk.bf16.vlgmr.msra.gmra.mxu3 %vm896_vm14, %v890_v43 }
 0x138   : > { %v1098_v63 = vsel %vm1039_vm15, %v4328_v61, 0 }
 0x139   : > { %1107 = vmatpush.bf16.msra.mxu3 %v1098_v63 }
 0x147   : > { %3031 = vmatmul.msk.bf16.vlgmr.msrb.gmra.mxu3 %vm896_vm14, %v4311_v45  ;;  %v1041_v45 = vsel %vm1039_vm15, %v1032_v53, 0 }
 0x148   : > { %1050 = vmatpush.bf16.msrb.mxu1 %v1041_v45 }
 0x17d   : > { %v1180_v49 = vpop.permute.xlu2 %1179 }
 0x17e   : > { %v1185_v51 = vsel %vm896_vm14, %v1180_v49, 0 }
 0x17f   : > { %1194 = vmatpush.bf16.xpose.msra.mxu2 %v1185_v51 }
 0x19a   : > { %v912_v56 = vpop.f32.mrf.mxu3 }
 0x19b   : > { %v973_v58 = vmul.f32 0.088388346, %v912_v56 }
 0x19d   : > { %v979_v25 = vsel %vm4324_vm0, %v973_v58, -inf  ;;  %v1209_v0 = vpop.permute.xlu0 %1208 }
 0x19e   : > { %v984_v62 = vsel %vm983_vm1, %v979_v25, -inf  ;;  %v1214_v1 = vsel %vm896_vm14, %v1209_v0, 0  ;;  %v4382_v0 = vpack.c.bf16 %v4317_v47, %v4317_v47 }
 0x19f   : > { %985 = vmax.xlane.f32.xlu0 %v984_v62  ;;  %1223 = vmatpush.bf16.xpose.msrb.mxu3 %v1214_v1  ;;  %v1143_v62 = vunpack.c.l.b16 %v4297_v35 }
 0x1a0   : > { %v1060_v1 = vsel %vm1039_vm15, %v4382_v0, 0  ;;  %v1310_v54 = vunpack.c.l.b16 %v4382_v0 }
 0x1a1   : > { %v4376_v63 = vpack.c.b16 %v1143_v62, %v1143_v62  ;;  %1069 = vmatpush.bf16.msra.mxu1 %v1060_v1 }
 0x1a2   : > { %v914_v2 = vpop.f32.mrf.mxu3  ;;  %v4417_v50 = vpack.c.b16 %v1310_v54, %v1310_v54 }
 0x1a3   : > { %v1151_v2 = vpop.permute.xlu2 %1150 }
 0x1aa   : > { %v931_v3 = vpop.f32.mrf.mxu3 }
 0x1ab   : > { %v974_v5 = vmul.f32 0.088388346, %v931_v3 }
 0x1ad   : > { %v980_v6 = vsel %vm4324_vm0, %v974_v5, -inf }
 0x1ae   : > { %v987_v59 = vsel %vm983_vm1, %v980_v6, -inf }
 0x1af   : > { %988 = vmax.xlane.f32.xlu1 %v987_v59  ;;  %v1156_v59 = vsel %vm896_vm14, %v1151_v2, 0 }
 0x1b2   : > { %v933_v7 = vpop.f32.mrf.mxu3 }
 0x1ba   : > { %v950_v8 = vpop.f32.mrf.mxu3 }
 0x1bb   : > { %v975_v9 = vmul.f32 0.088388346, %v950_v8 }
 0x1bd   : > { %v981_v10 = vsel %vm4324_vm0, %v975_v9, -inf }
 0x1be   : > { %v990_v11 = vsel %vm983_vm1, %v981_v10, -inf }
 0x1bf   : > { %991 = vmax.xlane.f32.xlu0 %v990_v11 }
 0x1c2   : > { %v952_v12 = vpop.f32.mrf.mxu3 }
 0x1ca   : > { %v969_v13 = vpop.f32.mrf.mxu3 }
 0x1cb   : > { %v976_v14 = vmul.f32 0.088388346, %v969_v13 }
 0x1cd   : > { %v982_v31 = vsel %vm4324_vm0, %v976_v14, -inf }
 0x1ce   : > { %v993_v16 = vsel %vm983_vm1, %v982_v31, -inf }
 0x1cf   : > { %994 = vmax.xlane.f32.xlu1 %v993_v16 }
 0x1d2   : > { %v971_v19 = vpop.f32.mrf.mxu3 }
 0x1d3   : > { %1174 = vrot.lane.b32.xlu0 %v4345_v32, %s3962_s1 }
 0x1e8   : > { %1121 = vrot.lane.b32.xlu1 %v4350_v21, %s3962_s1 }
 0x212   : > { %v986_v23 = vpop.xlane.xlu0 %985 }
 0x213   : > { %v996_v24 = vsub.f32 %v979_v25, %v986_v23 }
 0x215   : > { %v1000_v27 = vmul.f32 1.442695, %v996_v24 }
 0x217   : > { %3611 = vpow2.f32 %v1000_v27 }
 0x21d   : > { %v3612_v28 = vpop.eup %3611 }
 0x21e   : > { %v1008_v29 = vsel %vm983_vm1, %v3612_v28, 0.0 }
 0x21f   : > { %1009 = vadd.xlane.f32.xlu2 %v1008_v29 }
 0x222   : > { %v989_v26 = vpop.xlane.xlu1 %988 }
 0x223   : > { %v997_v34 = vsub.f32 %v980_v6, %v989_v26 }
 0x225   : > { %v1002_v30 = vmul.f32 1.442695, %v997_v34 }
 0x227   : > { %3613 = vpow2.f32 %v1002_v30 }
 0x22d   : > { %v3614_v38 = vpop.eup %3613 }
 0x22e   : > { %v1011_v18 = vsel %vm983_vm1, %v3614_v38, 0.0 }
 0x22f   : > { %1012 = vadd.xlane.f32.xlu1 %v1011_v18 }
 0x232   : > { %v992_v39 = vpop.xlane.xlu0 %991 }
 0x233   : > { %v998_v36 = vsub.f32 %v981_v10, %v992_v39 }
 0x235   : > { %v1004_v40 = vmul.f32 1.442695, %v998_v36 }
 0x237   : > { %3615 = vpow2.f32 %v1004_v40 }
 0x23d   : > { %v3616_v42 = vpop.eup %3615 }
 0x23e   : > { %v1014_v43 = vsel %vm983_vm1, %v3616_v42, 0.0 }
 0x23f   : > { %1015 = vadd.xlane.f32.xlu2 %v1014_v43 }
 0x242   : > { %v995_v48 = vpop.xlane.xlu1 %994 }
 0x243   : > { %v999_v49 = vsub.f32 %v982_v31, %v995_v48  ;;  %v4407_v48 = vpack.c.b16 %v1334_v44, %v1334_v44 }
 0x245   : > { %v1006_v51 = vmul.f32 1.442695, %v999_v49  ;;  %v1175_v12 = vpop.permute.xlu0 %1174 }
 0x247   : > { %3617 = vpow2.f32 %v1006_v51 }
 0x248   : > { %1116 = vrot.lane.b32.xlu1 %v4358_v52, %s3962_s1 }
 0x24d   : > { %v3618_v56 = vpop.eup %3617 }
 0x24e   : > { %v1017_v58 = vsel %vm983_vm1, %v3618_v56, 0.0 }
 0x24f   : > { %1018 = vadd.xlane.f32.xlu0 %v1017_v58 }
 0x250   : > { %1288 = vrot.lane.b32.xlu1 %v4364_v22, %s3962_s1 }
 0x257   : > { %1203 = vrot.lane.b32.xlu2 %v4370_v60, %s3962_s1 }
 0x25a   : > { %v1122_v46 = vpop.permute.xlu1 %1121 }
 0x25b   : > { %v1127_v25 = vsel %vm896_vm14, %v1122_v46, 0 }
 0x25c   : > { %1136 = vmatpush.bf16.xpose.msrb.mxu0 %v1127_v25 }
 0x263   : > { %1145 = vrot.lane.b32.xlu0 %v4376_v63, %s3962_s1 }
 0x292   : > { %v1010_v3 = vpop.xlane.xlu2 %1009 }
 0x293   : > { %3619 = vrcp.f32 %v1010_v3 }
 0x299   : > { %v3620_v35 = vpop.eup %3619 }
 0x29a   : > { %v1024_v5 = vmul.f32 %v3620_v35, %v3612_v28 }
 0x29c   : > { %v1028_v6 = vpack.c.bf16 %v1024_v5, %v1024_v5 }
 0x29e   : > { %3032 = vmatmul.msk.bf16.vlgmr.msrb.gmra.mxu1 %vm983_vm1, %v1028_v6 }
 0x29f   : > { %1165 = vmatpush.bf16.xpose.msrb.mxu1 %v1156_v59 }
 0x2a2   : > { %v1013_v47 = vpop.xlane.xlu1 %1012 }
 0x2a3   : > { %3621 = vrcp.f32 %v1013_v47 }
 0x2a9   : > { %v3622_v7 = vpop.eup %3621 }
 0x2aa   : > { %v1025_v8 = vmul.f32 %v3622_v7, %v3614_v38 }
 0x2ac   : > { %v1029_v9 = vpack.c.bf16 %v1025_v8, %v1025_v8 }
 0x2ae   : > { %3033 = vmatmul.msk.bf16.vlgmr.msra.gmra.mxu1 %vm983_vm1, %v1029_v9 }
 0x2b2   : > { %v1016_v10 = vpop.xlane.xlu2 %1015 }
 0x2b3   : > { %3623 = vrcp.f32 %v1016_v10 }
 0x2b9   : > { %v3624_v11 = vpop.eup %3623 }
 0x2ba   : > { %v1026_v13 = vmul.f32 %v3624_v11, %v3616_v42  ;;  %v1117_v14 = vpop.permute.xlu1 %1116  ;;  %v1204_v24 = vpop.permute.xlu2 %1203 }
 0x2bb   : > { %3036 = vmatmul.msk.bf16.vlgmr.msrb.gmra.mxu0 %vm896_vm14, %v1117_v14 }
 0x2bc   : > { %v1030_v15 = vpack.c.bf16 %v1026_v13, %v1026_v13 }
 0x2be   : > { %3034 = vmatmul.msk.bf16.vlgmr.msrb.gmra.mxu2 %vm983_vm1, %v1030_v15  ;;  %v1358_v15 = vunpack.c.l.b16 %v4328_v61 }
 0x2c2   : > { %v1019_v31 = vpop.xlane.xlu0 %1018  ;;  %v1289_v40 = vpop.permute.xlu1 %1288 }
 0x2c3   : > { %3625 = vrcp.f32 %v1019_v31  ;;  %v1294_v42 = vsel %vm1039_vm15, %v1289_v40, 0 }
 0x2c4   : > { %1303 = vmatpush.bf16.msra.mxu0 %v1294_v42 }
 0x2c9   : > { %v3626_v16 = vpop.eup %3625 }
 0x2ca   : > { %v1027_v19 = vmul.f32 %v3626_v16, %v3618_v56 }
 0x2cc   : > { %v1031_v17 = vpack.c.bf16 %v1027_v19, %v1027_v19  ;;  %v4437_v19 = vpack.c.b16 %v1358_v15, %v1358_v15 }
 0x2ce   : > { %3035 = vmatmul.msk.bf16.vlgmr.msra.gmra.mxu3 %vm983_vm1, %v1031_v17  ;;  %3038 = vmatmul.msk.bf16.vlgmr.msra.gmra.mxu2 %vm896_vm14, %v1175_v12 }
 0x2d5   : > { %v1146_v23 = vpop.permute.xlu0 %1145 }
 0x2d6   : > { %3037 = vmatmul.msk.bf16.vlgmr.msrb.gmra.mxu1 %vm896_vm14, %v1146_v23 }
 0x2de   : > { %3039 = vmatmul.msk.bf16.vlgmr.msrb.gmra.mxu3 %vm896_vm14, %v1204_v24 }
 0x31b   : > { %v4396_v27 = vpop.f32.mrf.mxu1 }
 0x323   : > { %v1054_v28 = vpop.f32.mrf.mxu1 }
 0x32b   : > { %v4398_v29 = vpop.f32.mrf.mxu1 }
 0x333   : > { %v1073_v26 = vpop.f32.mrf.mxu1 }
 0x338   : > { %v1138_v34 = vpop.f32.mrf.mxu0 }
 0x339   : > { %v1229_v30 = vmul.f32 0.088388346, %v1138_v34 }
 0x33b   : > { %v1233_v38 = vsel %vm4324_vm0, %v1229_v30, -inf }
 0x33c   : > { %v1237_v18 = vsel %vm983_vm1, %v1233_v38, -inf }
 0x33d   : > { %1238 = vmax.xlane.f32.xlu0 %v1237_v18 }
 0x340   : > { %v1140_v39 = vpop.f32.mrf.mxu0 }
 0x341   : > { %v4403_v36 = vpop.f32.mrf.mxu2 }
 0x349   : > { %v1092_v43 = vpop.f32.mrf.mxu2 }
 0x351   : > { %v1196_v49 = vpop.f32.mrf.mxu2  ;;  %1336 = vrot.lane.b32.xlu0 %v4407_v48, %s3962_s1  ;;  %v4411_v51 = vpop.f32.mrf.mxu3 }
 0x352   : > { %v1231_v53 = vmul.f32 0.088388346, %v1196_v49 }
 0x353   : > { %v1167_v56 = vpop.f32.mrf.mxu1 }
 0x354   : > { %v1235_v58 = vsel %vm4324_vm0, %v1231_v53, -inf  ;;  %v1230_v46 = vmul.f32 0.088388346, %v1167_v56 }
 0x355   : > { %v1243_v20 = vsel %vm983_vm1, %v1235_v58, -inf }
 0x356   : > { %1244 = vmax.xlane.f32.xlu2 %v1243_v20  ;;  %v1234_v45 = vsel %vm4324_vm0, %v1230_v46, -inf }
 0x357   : > { %v1240_v0 = vsel %vm983_vm1, %v1234_v45, -inf }
 0x359   : > { %v1198_v25 = vpop.f32.mrf.mxu2  ;;  %1312 = vrot.lane.b32.xlu0 %v4417_v50, %s3962_s1  ;;  %v1111_v62 = vpop.f32.mrf.mxu3 }
 0x35b   : > { %v1169_v1 = vpop.f32.mrf.mxu1 }
 0x35e   : > { %1241 = vmax.xlane.f32.xlu2 %v1240_v0 }
 0x361   : > { %1452 = vrot.lane.b32.xlu0 %v4304_v41, %s3963_s14  ;;  %v1225_v2 = vpop.f32.mrf.mxu3 }
 0x362   : > { %v1232_v3 = vmul.f32 0.088388346, %v1225_v2 }
 0x364   : > { %v1236_v35 = vsel %vm4324_vm0, %v1232_v3, -inf }
 0x365   : > { %v1246_v5 = vsel %vm983_vm1, %v1236_v35, -inf }
 0x366   : > { %1247 = vmax.xlane.f32.xlu1 %v1246_v5 }
 0x369   : > { %1427 = vrot.lane.b32.xlu0 %v4345_v32, %s3963_s14  ;;  %v1227_v6 = vpop.f32.mrf.mxu3 }
 0x37f   : > { %1383 = vrot.lane.b32.xlu1 %v4350_v21, %s3963_s14 }
 0x3b0   : > { %v1239_v59 = vpop.xlane.xlu0 %1238 }
 0x3b1   : > { %v1249_v47 = vsub.f32 %v1233_v38, %v1239_v59 }
 0x3b3   : > { %v1253_v7 = vmul.f32 1.442695, %v1249_v47 }
 0x3b5   : > { %3627 = vpow2.f32 %v1253_v7 }
 0x3bb   : > { %v3628_v8 = vpop.eup %3627 }
 0x3bc   : > { %v1261_v9 = vsel %vm983_vm1, %v3628_v8, 0.0 }
 0x3bd   : > { %1262 = vadd.xlane.f32.xlu2 %v1261_v9 }
 0x3c3   : > { %v1337_v10 = vpop.permute.xlu0 %1336 }
 0x3c4   : > { %v1342_v11 = vsel %vm1039_vm15, %v1337_v10, 0 }
 0x3c5   : > { %1351 = vmatpush.bf16.msrb.mxu2 %v1342_v11 }
 0x3c9   : > { %v1245_v12 = vpop.xlane.xlu2 %1244 }
 0x3ca   : > { %v1251_v17 = vsub.f32 %v1235_v58, %v1245_v12 }
 0x3cb   : > { %v1313_v13 = vpop.permute.xlu0 %1312 }
 0x3cc   : > { %v1318_v14 = vsel %vm1039_vm15, %v1313_v13, 0  ;;  %v1257_v24 = vmul.f32 1.442695, %v1251_v17 }
 0x3cd   : > { %1327 = vmatpush.bf16.msra.mxu1 %v1318_v14 }
 0x3d1   : > { %v1242_v31 = vpop.xlane.xlu2 %1241 }
 0x3d2   : > { %v1250_v16 = vsub.f32 %v1234_v45, %v1242_v31 }
 0x3d3   : > { %v1453_v53 = vpop.permute.xlu0 %1452 }
 0x3d4   : > { %v1255_v23 = vmul.f32 1.442695, %v1250_v16  ;;  %v1458_v20 = vsel %vm896_vm14, %v1453_v53, 0 }
 0x3d5   : > { %1360 = vrot.lane.b32.xlu2 %v4437_v19, %s3962_s1 }
 0x3d6   : > { %3629 = vpow2.f32 %v1255_v23 }
 0x3d7   : > { %3631 = vpow2.f32 %v1257_v24 }
 0x3d9   : > { %v1248_v28 = vpop.xlane.xlu1 %1247 }
 0x3da   : > { %v1252_v26 = vsub.f32 %v1236_v35, %v1248_v28 }
 0x3db   : > { %v1428_v0 = vpop.permute.xlu0 %1427 }
 0x3dc   : > { %v3630_v34 = vpop.eup %3629  ;;  %v1259_v30 = vmul.f32 1.442695, %v1252_v26 }
 0x3dd   : > { %1429 = vrot.lane.b32.xlu2 %v4293_v33, %s3963_s14  ;;  %v1264_v61 = vsel %vm983_vm1, %v3630_v34, 0.0  ;;  %v3632_v38 = vpop.eup %3631 }
 0x3de   : > { %3633 = vpow2.f32 %v1259_v30  ;;  %1265 = vadd.xlane.f32.xlu1 %v1264_v61  ;;  %v1267_v39 = vsel %vm983_vm1, %v3632_v38, 0.0 }
 0x3e4   : > { %v3634_v18 = vpop.eup %3633 }
 0x3e5   : > { %1406 = vrot.lane.b32.xlu2 %v4302_v37, %s3963_s14  ;;  %v1270_v40 = vsel %vm983_vm1, %v3634_v18, 0.0 }
 0x3e6   : > { %1268 = vadd.xlane.f32.xlu1 %v1267_v39  ;;  %1271 = vadd.xlane.f32.xlu0 %v1270_v40 }
 0x3ed   : > { %1381 = vrot.lane.b32.xlu2 %v4358_v52, %s3963_s14 }
 0x3f1   : > { %v1384_v42 = vpop.permute.xlu1 %1383 }
 0x3f2   : > { %v1389_v43 = vsel %vm896_vm14, %v1384_v42, 0 }
 0x3f3   : > { %1398 = vmatpush.bf16.xpose.msrb.mxu0 %v1389_v43 }
 0x3f5   : > { %1571 = vrot.lane.b32.xlu2 %v4407_v48, %s3963_s14 }
 0x3fa   : > { %1404 = vrot.lane.b32.xlu0 %v4376_v63, %s3963_s14 }
 0x3ff   : > { %1450 = vrot.lane.b32.xlu1 %v4370_v60, %s3963_s14 }
 0x402   : > { %1529 = vrot.lane.b32.xlu0 %v4364_v22, %s3963_s14 }
 0x40a   : > { %1592 = vrot.lane.b32.xlu0 %v4437_v19, %s3963_s14 }
 0x412   : > { %1638 = vrot.lane.b32.xlu0 %v4302_v37, %s3964_s12 }
 0x430   : > { %v1263_v44 = vpop.xlane.xlu2 %1262 }
 0x431   : > { %3635 = vrcp.f32 %v1263_v44 }
 0x437   : > { %v3636_v49 = vpop.eup %3635 }
 0x438   : > { %v1277_v54 = vmul.f32 %v3636_v49, %v3628_v8  ;;  %v1361_v56 = vpop.permute.xlu2 %1360 }
 0x439   : > { %v1366_v58 = vsel %vm1039_vm15, %v1361_v56, 0 }
 0x43a   : > { %v1281_v46 = vpack.c.bf16 %v1277_v54, %v1277_v54  ;;  %1375 = vmatpush.bf16.msra.mxu3 %v1366_v58 }
 0x43c   : > { %3040 = vmatmul.msk.bf16.vlgmr.msra.gmra.mxu0 %vm983_vm1, %v1281_v46 }
 0x43e   : > { %1467 = vmatpush.bf16.xpose.msrb.mxu3 %v1458_v20 }
 0x440   : > { %v1430_v25 = vpop.permute.xlu2 %1429 }
 0x441   : > { %v1435_v62 = vsel %vm896_vm14, %v1430_v25, 0 }
 0x442   : > { %1444 = vmatpush.bf16.xpose.msra.mxu2 %v1435_v62 }
 0x448   : > { %v1407_v37 = vpop.permute.xlu2 %1406 }
 0x449   : > { %v1412_v45 = vsel %vm896_vm14, %v1407_v37, 0 }
 0x44a   : > { %1421 = vmatpush.bf16.xpose.msrb.mxu1 %v1412_v45 }
 0x450   : > { %v1382_v1 = vpop.permute.xlu2 %1381 }
 0x451   : > { %3044 = vmatmul.msk.bf16.vlgmr.msrb.gmra.mxu0 %vm896_vm14, %v1382_v1  ;;  %v1266_v2 = vpop.xlane.xlu1 %1265 }
 0x452   : > { %3637 = vrcp.f32 %v1266_v2 }
 0x458   : > { %v3638_v3 = vpop.eup %3637  ;;  %v1572_v10 = vpop.permute.xlu2 %1571 }
 0x459   : > { %v1278_v35 = vmul.f32 %v3638_v3, %v3630_v34  ;;  %v1272_v5 = vpop.xlane.xlu0 %1271  ;;  %v1269_v6 = vpop.xlane.xlu1 %1268  ;;  %v1577_v13 = vsel %vm1039_vm15, %v1572_v10, 0 }
 0x45a   : > { %3639 = vrcp.f32 %v1272_v5 }
 0x45b   : > { %v1282_v59 = vpack.c.bf16 %v1278_v35, %v1278_v35  ;;  %3641 = vrcp.f32 %v1269_v6 }
 0x45d   : > { %3041 = vmatmul.msk.bf16.vlgmr.msra.gmra.mxu1 %vm983_vm1, %v1282_v59 }
 0x460   : > { %v3640_v47 = vpop.eup %3639 }
 0x461   : > { %v3642_v7 = vpop.eup %3641  ;;  %v1280_v8 = vmul.f32 %v3640_v47, %v3634_v18 }
 0x462   : > { %v1279_v9 = vmul.f32 %v3642_v7, %v3632_v38 }
 0x463   : > { %v1284_v11 = vpack.c.bf16 %v1280_v8, %v1280_v8 }
 0x464   : > { %v1283_v12 = vpack.c.bf16 %v1279_v9, %v1279_v9 }
 0x465   : > { %3043 = vmatmul.msk.bf16.vlgmr.msra.gmra.mxu3 %vm983_vm1, %v1284_v11 }
 0x466   : > { %3042 = vmatmul.msk.bf16.vlgmr.msrb.gmra.mxu2 %vm983_vm1, %v1283_v12 }
 0x467   : > { %1586 = vmatpush.bf16.msrb.mxu2 %v1577_v13 }
 0x46c   : > { %v1405_v14 = vpop.permute.xlu0 %1404 }
 0x46d   : > { %3045 = vmatmul.msk.bf16.vlgmr.msrb.gmra.mxu1 %vm896_vm14, %v1405_v14 }
 0x471   : > { %v1451_v15 = vpop.permute.xlu1 %1450 }
 0x474   : > { %v1530_v31 = vpop.permute.xlu0 %1529 }
 0x475   : > { %v1535_v16 = vsel %vm1039_vm15, %v1530_v31, 0  ;;  %3047 = vmatmul.msk.bf16.vlgmr.msrb.gmra.mxu3 %vm896_vm14, %v1451_v15 }
 0x476   : > { %3046 = vmatmul.msk.bf16.vlgmr.msra.gmra.mxu2 %vm896_vm14, %v1428_v0  ;;  %1544 = vmatpush.bf16.msra.mxu0 %v1535_v16 }
 0x47c   : > { %v1593_v17 = vpop.permute.xlu0 %1592 }
 0x47d   : > { %v1598_v23 = vsel %vm1039_vm15, %v1593_v17, 0 }
 0x47e   : > { %1607 = vmatpush.bf16.msra.mxu3 %v1598_v23 }
 0x484   : > { %v1639_v7 = vpop.permute.xlu0 %1638 }
 0x4b9   : > { %v4478_v24 = vpop.f32.mrf.mxu0 }
 0x4c1   : > { %v1307_v28 = vpop.f32.mrf.mxu0 }
 0x4ce   : > { %v1400_v26 = vpop.f32.mrf.mxu0 }
 0x4cf   : > { %v1473_v34 = vmul.f32 0.088388346, %v1400_v26 }
 0x4d1   : > { %v1477_v30 = vsel %vm4324_vm0, %v1473_v34, -inf }
 0x4d2   : > { %v1481_v61 = vsel %vm983_vm1, %v1477_v30, -inf }
 0x4d3   : > { %1482 = vmax.xlane.f32.xlu1 %v1481_v61 }
 0x4d6   : > { %v1402_v38 = vpop.f32.mrf.mxu0 }
 0x4da   : > { %v4483_v18 = vpop.f32.mrf.mxu1 }
 0x4db   : > { %v3563_v39 = vpack.i.bf16 %v4483_v18, %v4478_v24 }
 0x4e2   : > { %v1331_v40 = vpop.f32.mrf.mxu1 }
 0x4e8   : > { %v4487_v42 = vpop.f32.mrf.mxu3 }
 0x4e9   : > { %v4489_v43 = vpop.f32.mrf.mxu2 }
 0x4ea   : > { %v3578_v44 = vpack.i.bf16 %v4487_v42, %v4489_v43  ;;  %v1423_v49 = vpop.f32.mrf.mxu1 }
 0x4eb   : > { %v1474_v59 = vmul.f32 0.088388346, %v1423_v49 }
 0x4ec   : > { %1550 = vrot.lane.b32.xlu1 %v4417_v50, %s3963_s14 }
 0x4f0   : > { %v1379_v53 = vpop.f32.mrf.mxu3 }
 0x4f1   : > { %v1355_v54 = vpop.f32.mrf.mxu2 }
 0x4f2   : > { %v1425_v56 = vpop.f32.mrf.mxu1 }
 0x4f4   : > { %1615 = vrot.lane.b32.xlu1 %v4350_v21, %s3964_s12 }
 0x4f8   : > { %v1469_v58 = vpop.f32.mrf.mxu3 }
 0x4f9   : > { %v1446_v20 = vpop.f32.mrf.mxu2  ;;  %v1476_v1 = vmul.f32 0.088388346, %v1469_v58 }
 0x4fa   : > { %v1475_v46 = vmul.f32 0.088388346, %v1446_v20 }
 0x4fb   : > { %v1480_v0 = vsel %vm4324_vm0, %v1476_v1, -inf }
 0x4fc   : > { %v1479_v25 = vsel %vm4324_vm0, %v1475_v46, -inf  ;;  %v1490_v21 = vsel %vm983_vm1, %v1480_v0, -inf }
 0x4fd   : > { %v1487_v62 = vsel %vm983_vm1, %v1479_v25, -inf }
 0x4fe   : > { %1488 = vmax.xlane.f32.xlu0 %v1487_v62 }
 0x500   : > { %v1471_v37 = vpop.f32.mrf.mxu3 }
 0x501   : > { %v1448_v45 = vpop.f32.mrf.mxu2 }
 0x512   : > { %1613 = vrot.lane.b32.xlu0 %v4358_v52, %s3964_s12  ;;  %v1478_v52 = vsel %vm4324_vm0, %v1474_v59, -inf }
 0x513   : > { %v1484_v47 = vsel %vm983_vm1, %v1478_v52, -inf }
 0x51e   : > { %1491 = vmax.xlane.f32.xlu1 %v1490_v21 }
 0x537   : > { %1684 = vrot.lane.b32.xlu1 %v4304_v41, %s3964_s12  ;;  %v1644_v41 = vsel %vm896_vm14, %v1639_v7, 0 }
 0x546   : > { %v1483_v2 = vpop.xlane.xlu1 %1482 }
 0x547   : > { %v1493_v3 = vsub.f32 %v1477_v30, %v1483_v2 }
 0x549   : > { %v1497_v35 = vmul.f32 1.442695, %v1493_v3 }
 0x54b   : > { %3643 = vpow2.f32 %v1497_v35 }
 0x551   : > { %v3644_v5 = vpop.eup %3643 }
 0x552   : > { %v1505_v6 = vsel %vm983_vm1, %v3644_v5, 0.0 }
 0x553   : > { %1506 = vadd.xlane.f32.xlu2 %v1505_v6 }
 0x55b   : > { %1485 = vmax.xlane.f32.xlu2 %v1484_v47 }
 0x55e   : > { %v1551_v8 = vpop.permute.xlu1 %1550 }
 0x55f   : > { %v1556_v9 = vsel %vm1039_vm15, %v1551_v8, 0 }
 0x560   : > { %1565 = vmatpush.bf16.msra.mxu1 %v1556_v9 }
 0x564   : > { %1653 = vmatpush.bf16.xpose.msrb.mxu1 %v1644_v41 }
 0x566   : > { %v1616_v10 = vpop.permute.xlu1 %1615 }
 0x567   : > { %v1621_v11 = vsel %vm896_vm14, %v1616_v10, 0 }
 0x568   : > { %1630 = vmatpush.bf16.xpose.msrb.mxu0 %v1621_v11 }
 0x571   : > { %v1489_v12 = vpop.xlane.xlu0 %1488 }
 0x572   : > { %v1495_v13 = vsub.f32 %v1479_v25, %v1489_v12 }
 0x573   : > { %1661 = vrot.lane.b32.xlu2 %v4293_v33, %s3964_s12 }
 0x574   : > { %v1501_v14 = vmul.f32 1.442695, %v1495_v13 }
 0x576   : > { %3645 = vpow2.f32 %v1501_v14 }
 0x57c   : > { %v3646_v15 = vpop.eup %3645 }
 0x57d   : > { %v1511_v31 = vsel %vm983_vm1, %v3646_v15, 0.0 }
 0x57e   : > { %1512 = vadd.xlane.f32.xlu1 %v1511_v31 }
 0x591   : > { %v1492_v16 = vpop.xlane.xlu1 %1491 }
 0x592   : > { %v1496_v17 = vsub.f32 %v1480_v0, %v1492_v16 }
 0x594   : > { %v1503_v23 = vmul.f32 1.442695, %v1496_v17 }
 0x596   : > { %3647 = vpow2.f32 %v1503_v23 }
 0x597   : > { %1659 = vrot.lane.b32.xlu1 %v4345_v32, %s3964_s12 }
 0x59c   : > { %v3648_v28 = vpop.eup %3647 }
 0x59d   : > { %v1514_v26 = vsel %vm983_vm1, %v3648_v28, 0.0 }
 0x59e   : > { %1515 = vadd.xlane.f32.xlu2 %v1514_v26 }
 0x5a9   : > { %v1685_v34 = vpop.permute.xlu1 %1684 }
 0x5aa   : > { %v1690_v33 = vsel %vm896_vm14, %v1685_v34, 0 }
 0x5ab   : > { %1699 = vmatpush.bf16.xpose.msrb.mxu3 %v1690_v33 }
 0x5b6   : > { %1636 = vrot.lane.b32.xlu2 %v4376_v63, %s3964_s12  ;;  %v1614_v63 = vpop.permute.xlu0 %1613 }
 0x5c6   : > { %v1507_v30 = vpop.xlane.xlu2 %1506 }
 0x5c7   : > { %3649 = vrcp.f32 %v1507_v30 }
 0x5cd   : > { %v3650_v61 = vpop.eup %3649 }
 0x5ce   : > { %v1521_v38 = vmul.f32 %v3650_v61, %v3644_v5  ;;  %v1486_v40 = vpop.xlane.xlu2 %1485 }
 0x5cf   : > { %v1494_v49 = vsub.f32 %v1478_v52, %v1486_v40 }
 0x5d0   : > { %v1525_v53 = vpack.c.bf16 %v1521_v38, %v1521_v38 }
 0x5d1   : > { %v1499_v54 = vmul.f32 1.442695, %v1494_v49 }
 0x5d2   : > { %3048 = vmatmul.msk.bf16.vlgmr.msra.gmra.mxu0 %vm983_vm1, %v1525_v53 }
 0x5d3   : > { %3651 = vpow2.f32 %v1499_v54 }
 0x5d6   : > { %v1662_v32 = vpop.permute.xlu2 %1661 }
 0x5d7   : > { %v1667_v56 = vsel %vm896_vm14, %v1662_v32, 0 }
 0x5d8   : > { %1676 = vmatpush.bf16.xpose.msra.mxu2 %v1667_v56 }
 0x5d9   : > { %v3652_v58 = vpop.eup %3651 }
 0x5da   : > { %v1508_v20 = vsel %vm983_vm1, %v3652_v58, 0.0 }
 0x5db   : > { %1509 = vadd.xlane.f32.xlu0 %v1508_v20 }
 0x5e2   : > { %3052 = vmatmul.msk.bf16.vlgmr.msrb.gmra.mxu0 %vm896_vm14, %v1614_v63 }
 0x5ef   : > { %1682 = vrot.lane.b32.xlu0 %v4370_v60, %s3964_s12 }
 0x5f1   : > { %v1513_v46 = vpop.xlane.xlu1 %1512 }
 0x5f2   : > { %3653 = vrcp.f32 %v1513_v46 }
 0x5f8   : > { %v3654_v25 = vpop.eup %3653 }
 0x5f9   : > { %v1523_v62 = vmul.f32 %v3654_v25, %v3646_v15 }
 0x5fb   : > { %v1527_v37 = vpack.c.bf16 %v1523_v62, %v1523_v62 }
 0x5fd   : > { %3050 = vmatmul.msk.bf16.vlgmr.msrb.gmra.mxu2 %vm983_vm1, %v1527_v37 }
 0x609   : > { %v1660_v45 = vpop.permute.xlu1 %1659 }
 0x60d   : > { %3054 = vmatmul.msk.bf16.vlgmr.msra.gmra.mxu2 %vm896_vm14, %v1660_v45 }
 0x611   : > { %v1516_v1 = vpop.xlane.xlu2 %1515 }
 0x612   : > { %3655 = vrcp.f32 %v1516_v1 }
 0x618   : > { %v3656_v0 = vpop.eup %3655 }
 0x619   : > { %v1524_v21 = vmul.f32 %v3656_v0, %v3648_v28  ;;  %v1637_v10 = vpop.permute.xlu2 %1636 }
 0x61b   : > { %v1528_v2 = vpack.c.bf16 %v1524_v21, %v1524_v21 }
 0x61d   : > { %3051 = vmatmul.msk.bf16.vlgmr.msra.gmra.mxu3 %vm983_vm1, %v1528_v2 }
 0x64e   : > { %v1510_v3 = vpop.xlane.xlu0 %1509 }
 0x64f   : > { %3657 = vrcp.f32 %v1510_v3  ;;  %v1546_v60 = vpop.f32.mrf.mxu0 }
 0x655   : > { %v3658_v35 = vpop.eup %3657 }
 0x656   : > { %v1522_v5 = vmul.f32 %v3658_v35, %v3652_v58 }
 0x657   : > { %v1548_v6 = vpop.f32.mrf.mxu0 }
 0x658   : > { %v1526_v59 = vpack.c.bf16 %v1522_v5, %v1522_v5 }
 0x65a   : > { %3049 = vmatmul.msk.bf16.vlgmr.msra.gmra.mxu1 %vm983_vm1, %v1526_v59 }
 0x65f   : > { %v1632_v52 = vpop.f32.mrf.mxu0 }
 0x660   : > { %v1705_v47 = vmul.f32 0.088388346, %v1632_v52 }
 0x661   : > { %v1683_v7 = vpop.permute.xlu0 %1682 }
 0x662   : > { %3055 = vmatmul.msk.bf16.vlgmr.msrb.gmra.mxu3 %vm896_vm14, %v1683_v7  ;;  %v1709_v8 = vsel %vm4324_vm0, %v1705_v47, -inf }
 0x663   : > { %v1713_v9 = vsel %vm983_vm1, %v1709_v8, -inf }
 0x664   : > { %1714 = vmax.xlane.f32.xlu2 %v1713_v9 }
 0x667   : > { %v1634_v41 = vpop.f32.mrf.mxu0 }
 0x66a   : > { %3053 = vmatmul.msk.bf16.vlgmr.msrb.gmra.mxu1 %vm896_vm14, %v1637_v10 }
 0x680   : > { %v4538_v11 = vpop.f32.mrf.mxu2 }
 0x688   : > { %v1590_v12 = vpop.f32.mrf.mxu2 }
 0x690   : > { %v1678_v13 = vpop.f32.mrf.mxu2 }
 0x691   : > { %v1707_v14 = vmul.f32 0.088388346, %v1678_v13 }
 0x693   : > { %v1711_v15 = vsel %vm4324_vm0, %v1707_v14, -inf }
 0x694   : > { %v1719_v31 = vsel %vm983_vm1, %v1711_v15, -inf }
 0x695   : > { %1720 = vmax.xlane.f32.xlu0 %v1719_v31 }
 0x698   : > { %v1680_v16 = vpop.f32.mrf.mxu2 }
 0x6a0   : > { %v4543_v17 = vpop.f32.mrf.mxu3 }
 0x6a1   : > { %v3583_v23 = vpack.i.bf16 %v4543_v17, %v4538_v11 }
 0x6a8   : > { %v1611_v28 = vpop.f32.mrf.mxu3 }
 0x6d7   : > { %v1567_v26 = vpop.f32.mrf.mxu1  ;;  %v1715_v34 = vpop.xlane.xlu2 %1714 }
 0x6d8   : > { %v1725_v30 = vsub.f32 %v1709_v8, %v1715_v34  ;;  %v3568_v57 = vpack.i.bf16 %v1567_v26, %v1546_v60 }
 0x6da   : > { %v1729_v38 = vmul.f32 1.442695, %v1725_v30 }
 0x6dc   : > { %3659 = vpow2.f32 %v1729_v38  ;;  %v3384_v38 = vld [vmem:[#allocation7 + $0x30] sm:$0xff] }
 0x6df   : > { %v1569_v33 = vpop.f32.mrf.mxu1 }
 0x6e2   : > { %v3660_v46 = vpop.eup %3659 }
 0x6e3   : > { %v1737_v25 = vsel %vm983_vm1, %v3660_v46, 0.0 }
 0x6e5   : > { %v1701_v61 = vpop.f32.mrf.mxu3 }
 0x6e6   : > { %v1708_v40 = vmul.f32 0.088388346, %v1701_v61  ;;  %v3385_v61 = vld [vmem:[#allocation7 + $0x38] sm:$0xff] }
 0x6e7   : > { %v1655_v49 = vpop.f32.mrf.mxu1 }
 0x6e8   : > { %v1706_v53 = vmul.f32 0.088388346, %v1655_v49  ;;  %v1712_v54 = vsel %vm4324_vm0, %v1708_v40, -inf  ;;  %v3383_v40 = vld [vmem:[#allocation7 + $0x28] sm:$0xff]  ;;  %v3382_v49 = vld [vmem:[#allocation7 + $0x20] sm:$0xff] }
 0x6e9   : > { %v1722_v32 = vsel %vm983_vm1, %v1712_v54, -inf }
 0x6ea   : > { %1723 = vmax.xlane.f32.xlu2 %v1722_v32  ;;  %v1710_v56 = vsel %vm4324_vm0, %v1706_v53, -inf  ;;  %v3380_v32 = vld [vmem:[#allocation7 + $0x10] sm:$0xff] }
 0x6eb   : > { %v1716_v58 = vsel %vm983_vm1, %v1710_v56, -inf }
 0x6ec   : > { %1717 = vmax.xlane.f32.xlu1 %v1716_v58  ;;  %v3379_v58 = vld [vmem:[#allocation7 + $0x8] sm:$0xff] }
 0x6ed   : > { %v1703_v20 = vpop.f32.mrf.mxu3 }
 0x6ef   : > { %v1657_v63 = vpop.f32.mrf.mxu1 }
 0x6f4   : > { %1738 = vadd.xlane.f32.xlu1 %v1737_v25  ;;  %v3378_v25 = vld [vmem:[#allocation7] sm:$0xff] }
 0x702   : > { %1761 = vrot.lane.b32.xlu2 %v4364_v22, %s3964_s12 }
 0x708   : > { %v1721_v62 = vpop.xlane.xlu0 %1720 }
 0x709   : > { %v1727_v45 = vsub.f32 %v1711_v15, %v1721_v62 }
 0x70a   : > { %1824 = vrot.lane.b32.xlu2 %v4437_v19, %s3964_s12 }
 0x70b   : > { %v1733_v0 = vmul.f32 1.442695, %v1727_v45 }
 0x70d   : > { %1782 = vrot.lane.b32.xlu1 %v4417_v50, %s3964_s12 }
 0x712   : > { %3569 = vrot.lane.b32.xlu2 %v3568_v57, %s3963_s14 }
 0x715   : > { %3564 = vrot.lane.b32.xlu1 %v3563_v39, %s3964_s12 }
 0x71a   : > { %3579 = vrot.lane.b32.xlu2 %v3578_v44, %s3964_s12 }
 0x75d   : > { %v1724_v22 = vpop.xlane.xlu2 %1723 }
 0x75e   : > { %v1728_v18 = vsub.f32 %v1712_v54, %v1724_v22  ;;  %v3381_v54 = vld [vmem:[#allocation7 + $0x18] sm:$0xff] }
 0x75f   : > { %v1718_v37 = vpop.xlane.xlu1 %1717 }
 0x760   : > { %v1726_v19 = vsub.f32 %v1710_v56, %v1718_v37  ;;  %v1735_v44 = vmul.f32 1.442695, %v1728_v18 }
 0x762   : > { %v1731_v1 = vmul.f32 1.442695, %v1726_v19 }
 0x764   : > { %3661 = vpow2.f32 %v1731_v1 }
 0x765   : > { %v1762_v50 = vpop.permute.xlu2 %1761 }
 0x766   : > { %v1767_v21 = vsel %vm1039_vm15, %v1762_v50, 0 }
 0x767   : > { %v1739_v2 = vpop.xlane.xlu1 %1738  ;;  %1776 = vmatpush.bf16.msra.mxu0 %v1767_v21 }
 0x768   : > { %3663 = vrcp.f32 %v1739_v2 }
 0x769   : > { %3665 = vpow2.f32 %v1733_v0 }
 0x76a   : > { %v3662_v24 = vpop.eup %3661  ;;  %3667 = vpow2.f32 %v1735_v44 }
 0x76b   : > { %v1740_v39 = vsel %vm983_vm1, %v3662_v24, 0.0  ;;  %1977 = vmatpush.bf16.msrb.mxu0 %v3385_v61  ;;  %v3684_v61 = vld [vmem:[%s4161_s16 + $0x8] sm:$0xff] }
 0x76c   : > { %1741 = vadd.xlane.f32.xlu0 %v1740_v39 }
 0x76d   : > { %v1825_v42 = vpop.permute.xlu2 %1824 }
 0x76e   : > { %v3664_v43 = vpop.eup %3663  ;;  %v1830_v3 = vsel %vm1039_vm15, %v1825_v42, 0 }
 0x76f   : > { %v1753_v60 = vmul.f32 %v3664_v43, %v3660_v46  ;;  %1839 = vmatpush.bf16.msra.mxu3 %v1830_v3  ;;  %v3666_v35 = vpop.eup %3665  ;;  %1978 = vmatpush.bf16.msrb.mxu0 %v3384_v38 }
 0x770   : > { %v1743_v6 = vsel %vm983_vm1, %v3666_v35, 0.0  ;;  %v3668_v59 = vpop.eup %3667 }
 0x771   : > { %v1757_v5 = vpack.c.bf16 %v1753_v60, %v1753_v60  ;;  %v1746_v52 = vsel %vm983_vm1, %v3668_v59, 0.0 }
 0x773   : > { %3056 = vmatmul.msk.bf16.vlgmr.msra.gmra.mxu0 %vm983_vm1, %v1757_v5 }
 0x774   : > { %1744 = vadd.xlane.f32.xlu0 %v1743_v6  ;;  %1979 = vmatpush.bf16.msrb.mxu0 %v3383_v40 }
 0x775   : > { %v3570_v37 = vpop.permute.xlu2 %3569 }
 0x776   : > { %v3572_v1 = vunpack.i.h.bf16 %v3570_v37  ;;  %v3571_v50 = vunpack.i.l.bf16 %v3570_v37 }
 0x778   : > { %1980 = vmatpush.bf16.msrb.mxu0 %v3382_v49  ;;  %v3417_v49 = vld [vmem:[#allocation10 + $0xf4] sm:$0xf0] }
 0x77c   : > { %1747 = vadd.xlane.f32.xlu0 %v1746_v52  ;;  %1981 = vmatpush.bf16.msrb.mxu0 %v3381_v54  ;;  %v3216_v54 = vld [vmem:[#allocation10 + $0xf8] sm:$0xf0] }
 0x77f   : > { %v1783_v47 = vpop.permute.xlu1 %1782 }
 0x780   : > { %v1788_v7 = vsel %vm1039_vm15, %v1783_v47, 0  ;;  %1982 = vmatpush.bf16.msrb.mxu0 %v3380_v32 }
 0x781   : > { %1797 = vmatpush.bf16.msra.mxu1 %v1788_v7 }
 0x784   : > { %1983 = vmatpush.bf16.msrb.mxu0 %v3379_v58 }
 0x787   : > { %v3565_v57 = vpop.permute.xlu1 %3564 }
 0x788   : > { %1984 = vmatpush.bf16.msrb.mxu0 %v3378_v25  ;;  %v3567_v22 = vunpack.i.h.bf16 %v3565_v57  ;;  %v3566_v62 = vunpack.i.l.bf16 %v3565_v57  ;;  %v3410_v57 = vld [vmem:[#allocation10 + $0xc4] sm:$0xf] }
 0x78a   : > { %v1894_v19 = vsel %vm896_vm14, %v4398_v29, %v3567_v22  ;;  %v1893_v45 = vsel %vm896_vm14, %v4396_v27, %v3566_v62  ;;  %v3580_v29 = vpop.permute.xlu2 %3579  ;;  %v3192_v22 = vld [vmem:[#allocation10 + $0xd0] sm:$0xf0]  ;;  %v3198_v62 = vld [vmem:[#allocation10 + $0xc8] sm:$0xf] }
 0x78b   : > { %v1899_v18 = vsel %vm1897_vm2, %v1894_v19, %v3572_v1  ;;  %v3582_v27 = vunpack.i.h.bf16 %v3580_v29  ;;  %v3581_v3 = vunpack.i.l.bf16 %v3580_v29  ;;  %v3413_v1 = vld [vmem:[#allocation10 + $0xd4] sm:$0xf0]  ;;  %v3406_v29 = vld [vmem:[#allocation10 + $0xa4] sm:$0xf] }
 0x78d   : > { %v1896_v6 = vsel %vm896_vm14, %v4411_v51, %v3582_v27  ;;  %v3182_v27 = vld [vmem:[#allocation10 + $0xa8] sm:$0xf] }
 0x790   : > { %1803 = vrot.lane.b32.xlu0 %v4407_v48, %s3964_s12  ;;  %s2789_s12 = sshll.u32 %s4689_s4, 4  ;;  %s2790_s12 = int_to_ptr.vmem [resolvable:$true] %s2789_s12 }
 0x798   : > { %3584 = vrot.lane.b32.xlu0 %v3583_v23, %s3963_s14 }
 0x7df   : > { %v1742_v8 = vpop.xlane.xlu0 %1741 }
 0x7e0   : > { %3669 = vrcp.f32 %v1742_v8 }
 0x7e6   : > { %v3670_v9 = vpop.eup %3669 }
 0x7e7   : > { %v1754_v41 = vmul.f32 %v3670_v9, %v3662_v24  ;;  %v1745_v10 = vpop.xlane.xlu0 %1744  ;;  %v1898_v24 = vsel %vm1897_vm2, %v1893_v45, %v3571_v50  ;;  %v3195_v45 = vor.u32 %v3410_v57, %v3192_v22  ;;  %v3411_v50 = vld [vmem:[#allocation10 + $0xcc] sm:$0xf] }
 0x7e9   : > { %v1758_v12 = vpack.c.bf16 %v1754_v41, %v1754_v41 }
 0x7eb   : > { %3057 = vmatmul.msk.bf16.vlgmr.msra.gmra.mxu1 %vm983_vm1, %v1758_v12  ;;  %v4604_v12 = vld [vmem:[#allocation8] ss:$0 sm:$0xff] }
 0x7ef   : > { %v1748_v13 = vpop.xlane.xlu0 %1747 }
 0x7f0   : > { %3671 = vrcp.f32 %v1748_v13  ;;  %v1778_v14 = vpop.f32.mrf.mxu0 }
 0x7f1   : > { %3673 = vrcp.f32 %v1745_v10 }
 0x7f6   : > { %v3672_v15 = vpop.eup %3671 }
 0x7f7   : > { %v1756_v31 = vmul.f32 %v3672_v15, %v3668_v59  ;;  %v3674_v11 = vpop.eup %3673  ;;  %v1895_v59 = vsel %vm896_vm14, %v4403_v36, %v3581_v3 }
 0x7f8   : > { %v1780_v48 = vpop.f32.mrf.mxu0  ;;  %v1755_v17 = vmul.f32 %v3674_v11, %v3666_v35 }
 0x7f9   : > { %v1760_v16 = vpack.c.bf16 %v1756_v31, %v1756_v31 }
 0x7fa   : > { %v1759_v26 = vpack.c.bf16 %v1755_v17, %v1755_v17  ;;  %v3206_v17 = vld [vmem:[#allocation10 + $0xe0] sm:$0xf] }
 0x7fb   : > { %3059 = vmatmul.msk.bf16.vlgmr.msra.gmra.mxu3 %vm983_vm1, %v1760_v16 }
 0x802   : > { %v1804_v23 = vpop.permute.xlu0 %1803 }
 0x803   : > { %v1809_v28 = vsel %vm1039_vm15, %v1804_v23, 0  ;;  %v3416_v23 = vld [vmem:[#allocation10 + $0xec] sm:$0xf0] }
 0x804   : > { %1818 = vmatpush.bf16.msrb.mxu2 %v1809_v28  ;;  %v3207_v28 = vor.u32 %v3416_v23, %v3206_v17  ;;  %v3168_v23 = vld [vmem:[#allocation10 + $0x98] sm:$0xf0] }
 0x806   : > { %2332 = vmatpush.bf16.msrb.mxu1 %v3207_v28 }
 0x807   : > { %3058 = vmatmul.msk.bf16.vlgmr.msrb.gmra.mxu2 %vm983_vm1, %v1759_v26  ;;  %v3414_v26 = vld [vmem:[#allocation10 + $0xe4] sm:$0xf] }
 0x80a   : > { %v3585_v44 = vpop.permute.xlu0 %3584 }
 0x80b   : > { %v3587_v60 = vunpack.i.h.bf16 %v3585_v44  ;;  %v3586_v35 = vunpack.i.l.bf16 %v3585_v44  ;;  %v3176_v44 = vld [vmem:[#allocation10 + $0xb0] sm:$0xf0] }
 0x80d   : > { %v1900_v7 = vsel %vm1897_vm2, %v1895_v59, %v3586_v35  ;;  %v1901_v8 = vsel %vm1897_vm2, %v1896_v6, %v3587_v60  ;;  %v3179_v35 = vor.u32 %v3406_v29, %v3176_v44  ;;  %v3407_v6 = vld [vmem:[#allocation10 + $0xac] sm:$0xf]  ;;  %v3184_v59 = vld [vmem:[#allocation10 + $0xb8] sm:$0xf0] }
 0x868   : > { %v1799_v34 = vpop.f32.mrf.mxu1 }
 0x869   : > { %v3573_v33 = vpack.i.bf16 %v1799_v34, %v1778_v14  ;;  %v3683_v14 = vld [vmem:[%s4161_s16] sm:$0xff]  ;;  %v3208_v34 = vld [vmem:[#allocation10 + $0xf0] sm:$0xf0] }
 0x86a   : > { %v3211_v40 = vor.u32 %v3414_v26, %v3208_v34 }
 0x86b   : > { %3574 = vrot.lane.b32.xlu1 %v3573_v33, %s3962_s1  ;;  %v3214_v33 = vld [vmem:[#allocation10 + $0xe8] sm:$0xf] }
 0x86c   : > { %v3215_v32 = vor.u32 %v3417_v49, %v3214_v33  ;;  %2351 = vmatpush.bf16.msra.mxu2 %v3211_v40  ;;  %v3142_v33 = vld [vmem:[#allocation10 + $0x60] sm:$0xf]  ;;  %v3144_v49 = vld [vmem:[#allocation10 + $0x70] sm:$0xf0] }
 0x86e   : > { %2370 = vmatpush.bf16.msrb.mxu3 %v3215_v32 }
 0x870   : > { %v1801_v30 = vpop.f32.mrf.mxu1  ;;  %2352 = vmatpush.bf16.msra.mxu2 %v3195_v45 }
 0x874   : > { %2353 = vmatpush.bf16.msra.mxu2 %v3179_v35  ;;  %v3390_v35 = vld [vmem:[#allocation10 + $0x24] sm:$0xf] }
 0x87e   : > { %v1841_v53 = vpop.f32.mrf.mxu3 }
 0x886   : > { %v1843_v56 = vpop.f32.mrf.mxu3 }
 0x88a   : > { %v1820_v20 = vpop.f32.mrf.mxu2 }
 0x88b   : > { %v3588_v63 = vpack.i.bf16 %v1841_v53, %v1820_v20  ;;  %v3415_v53 = vld [vmem:[#allocation10 + $0xec] sm:$0xf] }
 0x88c   : > { %v3219_v56 = vor.u32 %v3415_v53, %v3216_v54  ;;  %v3150_v53 = vld [vmem:[#allocation10 + $0x68] sm:$0xf]  ;;  %v3401_v54 = vld [vmem:[#allocation10 + $0x74] sm:$0xf0] }
 0x88d   : > { %3589 = vrot.lane.b32.xlu1 %v3588_v63, %s3962_s1  ;;  %v3190_v63 = vld [vmem:[#allocation10 + $0xc0] sm:$0xf]  ;;  %s4773_s1 = sld [smem:[#allocation25_spill]] }
 0x88e   : > { %2389 = vmatpush.bf16.msra.mxu0 %v3219_v56 }
 0x892   : > { %v1822_v46 = vpop.f32.mrf.mxu2 }
 0x893   : > { %v3412_v46 = vld [vmem:[#allocation10 + $0xcc] sm:$0xf0]  ;;  %s2788_s14 = scalar_lea.hbm %s4773_s1, %s3450_s6  ;;  %s3887_s27 = scalar_lea.hbm %s4773_s1, 64 }
 0x894   : > { %v3191_v25 = vor.u32 %v3412_v46, %v3190_v63  ;;  %v3399_v63 = vld [vmem:[#allocation10 + $0x6c] sm:$0xf]  ;;  %v3152_v46 = vld [vmem:[#allocation10 + $0x78] sm:$0xf0]  ;;  %s2791_s20 = sshll.u32 %s2788_s14, 4  ;;  %s2792_s20 = int_to_ptr.hbm [resolvable:$true] %s2791_s20 }
 0x895   : > { %s3881_s26 = sshra.s32 %s2792_s20, 4  ;;  %s3882_s26 = int_to_ptr.hbm [resolvable:$true] %s3881_s26 }
 0x896   : > { %2333 = vmatpush.bf16.msrb.mxu1 %v3191_v25  ;;  %v3155_v25 = vor.u32 %v3399_v63, %v3152_v46  ;;  %s3883_s13 = scalar_lea.hbm %s3882_s26, 32  ;;  %p3888_p13 = scmp.lt.s32.totalorder %s3882_s26, %s4773_s1 }
 0x897   : > { %p3884_p1 = scmp.ne.s32.totalorder %s3882_s26, %s3883_s13  ;;  %p3889_p7 = scmp.lt.s32.totalorder %s3887_s27, %s3883_s13 }
 0x899   : > { %p3885_p3 = pnand %p3884_p1, %p4122_p0  ;;  %p3890_p8 = por %p3889_p7, %p3888_p13 }
 0x89b   : > { %p3886_p5 = pneg %p3885_p3 }
 0x89d   : > { %p3891_p9 = pnand %p3890_p8, %p3886_p5 }
 0x8dd   : > { %v3575_v0 = vpop.permute.xlu1 %3574 }
 0x8de   : > { %v3577_v21 = vunpack.i.h.bf16 %v3575_v0  ;;  %v3576_v2 = vunpack.i.l.bf16 %v3575_v0  ;;  %v3200_v0 = vld [vmem:[#allocation10 + $0xd8] sm:$0xf0] }
 0x8e0   : > { %v1903_v39 = vsel %vm1902_vm3, %v1898_v24, %v3576_v2  ;;  %v1904_v42 = vsel %vm1902_vm3, %v1899_v18, %v3577_v21  ;;  %v3199_v21 = vor.u32 %v3413_v1, %v3198_v62  ;;  %v3203_v2 = vor.u32 %v3411_v50, %v3200_v0  ;;  %v3126_v62 = vld [vmem:[#allocation10 + $0x40] sm:$0xf]  ;;  %v3128_v1 = vld [vmem:[#allocation10 + $0x50] sm:$0xf0]  ;;  %v3134_v50 = vld [vmem:[#allocation10 + $0x48] sm:$0xf] }
 0x8e1   : > { %v1907_v43 = vpack.c.bf16 %v1904_v42, %v1903_v39  ;;  %v3174_v39 = vld [vmem:[#allocation10 + $0xa0] sm:$0xf]  ;;  %v3408_v42 = vld [vmem:[#allocation10 + $0xac] sm:$0xf0]  ;;  %v3397_v0 = vld [vmem:[#allocation10 + $0x54] sm:$0xf0] }
 0x8e2   : > { %2371 = vmatpush.bf16.msrb.mxu3 %v3199_v21  ;;  %2390 = vmatpush.bf16.msra.mxu0 %v3203_v2 }
 0x8e3   : > { %1985 = vmatmul.bf16.vlgmr.msrb.gmra.mxu0 %v1907_v43  ;;  %v3175_v43 = vor.u32 %v3408_v42, %v3174_v39  ;;  %v3395_v39 = vld [vmem:[#allocation10 + $0x4c] sm:$0xf]  ;;  %v3136_v42 = vld [vmem:[#allocation10 + $0x58] sm:$0xf0] }
 0x8e5   : > { %2334 = vmatpush.bf16.msrb.mxu1 %v3175_v43  ;;  %v3139_v43 = vor.u32 %v3395_v39, %v3136_v42 }
 0x8ff   : > { %v3590_v5 = vpop.permute.xlu1 %3589 }
 0x900   : > { %v3592_v52 = vunpack.i.h.bf16 %v3590_v5  ;;  %v3591_v47 = vunpack.i.l.bf16 %v3590_v5  ;;  %v3409_v5 = vld [vmem:[#allocation10 + $0xb4] sm:$0xf0] }
 0x902   : > { %v1905_v9 = vsel %vm1902_vm3, %v1900_v7, %v3591_v47  ;;  %v1906_v41 = vsel %vm1902_vm3, %v1901_v8, %v3592_v52  ;;  %v3183_v52 = vor.u32 %v3409_v5, %v3182_v27  ;;  %v3187_v47 = vor.u32 %v3407_v6, %v3184_v59  ;;  %v3110_v27 = vld [vmem:[#allocation10 + $0x20] sm:$0xf]  ;;  %v3112_v59 = vld [vmem:[#allocation10 + $0x30] sm:$0xf0] }
 0x903   : > { %v1908_v10 = vpack.c.bf16 %v1906_v41, %v1905_v9  ;;  %v3158_v9 = vld [vmem:[#allocation10 + $0x80] sm:$0xf]  ;;  %v3404_v41 = vld [vmem:[#allocation10 + $0x8c] sm:$0xf0] }
 0x904   : > { %2372 = vmatpush.bf16.msrb.mxu3 %v3183_v52  ;;  %2391 = vmatpush.bf16.msra.mxu0 %v3187_v47  ;;  %v3118_v52 = vld [vmem:[#allocation10 + $0x28] sm:$0xf]  ;;  %v3393_v47 = vld [vmem:[#allocation10 + $0x34] sm:$0xf0] }
 0x905   : > { %1990 = vmatmul.bf16.gmra.mxu0 %v1908_v10  ;;  %v3159_v10 = vor.u32 %v3404_v41, %v3158_v9  ;;  %v3115_v41 = vor.u32 %v3390_v35, %v3112_v59 }
 0x907   : > { %2335 = vmatpush.bf16.msrb.mxu1 %v3159_v10  ;;  %v3391_v10 = vld [vmem:[#allocation10 + $0x2c] sm:$0xf] }
 0x960   : > { %v1986_v13 = vpop.f32.mrf.mxu0 }
 0x961   : > { %v1987_v51 = vadd.f32 %v4604_v12, %v1986_v13  ;;  %v3402_v13 = vld [vmem:[#allocation10 + $0x84] sm:$0xf] }
 0x963   : > { %v4608_v36 = vadd.f32 %v3683_v14, %v1987_v51  ;;  %v3160_v51 = vld [vmem:[#allocation10 + $0x90] sm:$0xf0]  ;;  %v3166_v14 = vld [vmem:[#allocation10 + $0x88] sm:$0xf] }
 0x965   : > { %v2002_v15 = vrot.slane %v4608_v36, 4 }
 0x967   : > { %v2003_v31 = vadd.f32 %v2002_v15, %v4608_v36 }
 0x968   : > { %v1988_v48 = vpop.f32.mrf.mxu0 }
 0x969   : > { %v2004_v16 = vrot.slane %v2003_v31, 2  ;;  %v1989_v11 = vadd.f32 %v4604_v12, %v1988_v48  ;;  %v3163_v48 = vor.u32 %v3402_v13, %v3160_v51  ;;  %v3120_v13 = vld [vmem:[#allocation10 + $0x38] sm:$0xf0]  ;;  %v3119_v51 = vor.u32 %v3393_v47, %v3118_v52 }
 0x96b   : > { %v2005_v30 = vadd.f32 %v2004_v16, %v2003_v31  ;;  %v4614_v38 = vadd.f32 %v3684_v61, %v1989_v11  ;;  %v3405_v16 = vld [vmem:[#allocation10 + $0x94] sm:$0xf0]  ;;  %v3403_v11 = vld [vmem:[#allocation10 + $0x8c] sm:$0xf]  ;;  %2354 = vmatpush.bf16.msra.mxu2 %v3163_v48  ;;  %v3398_v61 = vld [vmem:[#allocation10 + $0x64] sm:$0xf] }
 0x96c   : > { %v3167_v17 = vor.u32 %v3405_v16, %v3166_v14  ;;  %v3171_v34 = vor.u32 %v3403_v11, %v3168_v23  ;;  %v3123_v14 = vor.u32 %v3391_v10, %v3120_v13  ;;  %v3685_v48 = vld [vmem:[%s4161_s16 + $0x10] sm:$0xff]  ;;  %v3094_v11 = vld [vmem:[#allocation10] sm:$0xf] }
 0x96d   : > { %v2006_v58 = vrot.slane %v2005_v30, 1  ;;  %v2008_v20 = vrot.slane %v4614_v38, 4 }
 0x96e   : > { %2373 = vmatpush.bf16.msrb.mxu3 %v3167_v17  ;;  %2392 = vmatpush.bf16.msra.mxu0 %v3171_v34  ;;  %v3388_v17 = vld [vmem:[#allocation10 + $0xc] sm:$0xf0]  ;;  %v3102_v34 = vld [vmem:[#allocation10 + $0x8] sm:$0xf] }
 0x96f   : > { %v2007_v37 = vadd.f32 %v2006_v58, %v2005_v30  ;;  %v2009_v19 = vadd.f32 %v2008_v20, %v4614_v38  ;;  %v3400_v30 = vld [vmem:[#allocation10 + $0x6c] sm:$0xf0]  ;;  %v3147_v58 = vor.u32 %v3398_v61, %v3144_v49  ;;  %v3151_v20 = vor.u32 %v3401_v54, %v3150_v53  ;;  %v3389_v61 = vld [vmem:[#allocation10 + $0x14] sm:$0xf0]  ;;  %v3104_v54 = vld [vmem:[#allocation10 + $0x18] sm:$0xf0] }
 0x970   : > { %v3143_v40 = vor.u32 %v3400_v30, %v3142_v33  ;;  %v3095_v23 = vor.u32 %v3388_v17, %v3094_v11  ;;  %v3103_v53 = vor.u32 %v3389_v61, %v3102_v34 }
 0x971   : > { %v2026_v24 = vmul.f32 %v2007_v37, %v4201_v4  ;;  %v2010_v18 = vrot.slane %v2009_v19, 2  ;;  %2355 = vmatpush.bf16.msra.mxu2 %v3147_v58  ;;  %v3396_v37 = vld [vmem:[#allocation10 + $0x4c] sm:$0xf0] }
 0x972   : > { %2336 = vmatpush.bf16.msrb.mxu1 %v3143_v40  ;;  %2374 = vmatpush.bf16.msrb.mxu3 %v3151_v20  ;;  %v3127_v45 = vor.u32 %v3396_v37, %v3126_v62  ;;  %v3387_v40 = vld [vmem:[#allocation10 + $0xc] sm:$0xf] }
 0x973   : > { %v4620_v3 = vsub.f32 %v4608_v36, %v2026_v24  ;;  %v2011_v60 = vadd.f32 %v2010_v18, %v2009_v19  ;;  %v3394_v19 = vld [vmem:[#allocation10 + $0x44] sm:$0xf]  ;;  %2393 = vmatpush.bf16.msra.mxu0 %v3155_v25  ;;  %v3135_v18 = vor.u32 %v3397_v0, %v3134_v50  ;;  %v3107_v20 = vor.u32 %v3387_v40, %v3104_v54 }
 0x974   : > { %v3131_v24 = vor.u32 %v3394_v19, %v3128_v1  ;;  %v3686_v19 = vld [vmem:[%s4161_s16 + $0x18] sm:$0xff] }
 0x975   : > { %v2034_v7 = vmul.f32 %v4620_v3, %v4620_v3  ;;  %v2012_v8 = vrot.slane %v2011_v60, 1 }
 0x976   : > { %2337 = vmatpush.bf16.msrb.mxu1 %v3127_v45  ;;  %2356 = vmatpush.bf16.msra.mxu2 %v3131_v24 }
 0x977   : > { %v2038_v15 = vrot.slane %v2034_v7, 4  ;;  %v2013_v31 = vadd.f32 %v2012_v8, %v2011_v60  ;;  %v3392_v60 = vld [vmem:[#allocation10 + $0x2c] sm:$0xf0]  ;;  %2375 = vmatpush.bf16.msrb.mxu3 %v3135_v18  ;;  %2394 = vmatpush.bf16.msra.mxu0 %v3139_v43 }
 0x978   : > { %v3111_v6 = vor.u32 %v3392_v60, %v3110_v27 }
 0x979   : > { %v2039_v28 = vadd.f32 %v2038_v15, %v2034_v7  ;;  %v2027_v26 = vmul.f32 %v2013_v31, %v4201_v4 }
 0x97a   : > { %2338 = vmatpush.bf16.msrb.mxu1 %v3111_v6  ;;  %2357 = vmatpush.bf16.msra.mxu2 %v3115_v41 }
 0x97b   : > { %v2040_v32 = vrot.slane %v2039_v28, 2  ;;  %v4626_v56 = vsub.f32 %v4614_v38, %v2027_v26  ;;  %2376 = vmatpush.bf16.msrb.mxu3 %v3119_v51  ;;  %v3096_v26 = vld [vmem:[#allocation10 + $0x10] sm:$0xf0]  ;;  %2395 = vmatpush.bf16.msra.mxu0 %v3123_v14  ;;  %v4658_v14 = vld [vmem:[%s4742_s10] ss:$0 sm:$0xff] }
 0x97d   : > { %v2041_v57 = vadd.f32 %v2040_v32, %v2039_v28  ;;  %v2035_v22 = vmul.f32 %v4626_v56, %v4626_v56  ;;  %v3386_v28 = vld [vmem:[#allocation10 + $0x4] sm:$0xf] }
 0x97e   : > { %2339 = vmatpush.bf16.msrb.mxu1 %v3095_v23  ;;  %v3099_v49 = vor.u32 %v3386_v28, %v3096_v26  ;;  %v4667_v28 = vld [vmem:[%s4743_s11] ss:$0 sm:$0xff] }
 0x97f   : > { %v2042_v21 = vrot.slane %v2041_v57, 1  ;;  %v2044_v2 = vrot.slane %v2035_v22, 4  ;;  %2377 = vmatpush.bf16.msrb.mxu3 %v3103_v53  ;;  %2396 = vmatpush.bf16.msra.mxu0 %v3107_v20  ;;  %v3425_v20 = vld [vmem:[#allocation11 + $0x38] sm:$0xff] }
 0x980   : > { %2358 = vmatpush.bf16.msra.mxu2 %v3099_v49 }
 0x981   : > { %v2043_v29 = vadd.f32 %v2042_v21, %v2041_v57  ;;  %v2045_v44 = vadd.f32 %v2044_v2, %v2035_v22 }
 0x982   : > { %v1991_v5 = vpop.f32.mrf.mxu0  ;;  %2692 = vmatpush.bf16.msra.mxu1 %v3425_v20 }
 0x983   : > { %v2062_v7 = vmul.f32 %v2043_v29, %v4232_v55  ;;  %v2046_v8 = vrot.slane %v2045_v44, 2  ;;  %v1992_v9 = vadd.f32 %v4604_v12, %v1991_v5 }
 0x985   : > { %v2066_v15 = vadd.f32 1e-05, %v2062_v7  ;;  %v2047_v31 = vadd.f32 %v2046_v8, %v2045_v44  ;;  %v4633_v16 = vadd.f32 %v3685_v48, %v1992_v9 }
 0x987   : > { %3675 = vrsqrt.f32 %v2066_v15  ;;  %v2048_v33 = vrot.slane %v2047_v31, 1  ;;  %v2014_v30 = vrot.slane %v4633_v16, 4  ;;  %vm2076_vm5 = vweird.f32 %v2066_v15 }
 0x989   : > { %v2049_v32 = vadd.f32 %v2048_v33, %v2047_v31  ;;  %v2015_v58 = vadd.f32 %v2014_v30, %v4633_v16 }
 0x98a   : > { %v1993_v63 = vpop.f32.mrf.mxu0 }
 0x98b   : > { %v2063_v46 = vmul.f32 %v2049_v32, %v4232_v55  ;;  %v2016_v25 = vrot.slane %v2015_v58, 2  ;;  %v1994_v57 = vadd.f32 %v4604_v12, %v1993_v63  ;;  %v3449_v63 = vld [vmem:[#allocation11 + $0xf8] sm:$0xff] }
 0x98c   : > { %2749 = vmatpush.bf16.msrb.mxu0 %v3449_v63 }
 0x98d   : > { %v3676_v22 = vpop.eup %3675  ;;  %v2067_v62 = vadd.f32 1e-05, %v2063_v46  ;;  %v2017_v37 = vadd.f32 %v2016_v25, %v2015_v58  ;;  %v4640_v45 = vadd.f32 %v3686_v19, %v1994_v57  ;;  %v3433_v25 = vld [vmem:[#allocation11 + $0x78] sm:$0xff] }
 0x98e   : > { %v2071_v1 = vmul.f32 %v3676_v22, %v2066_v15  ;;  %vm2077_vm4 = vweird.f32 %v3676_v22  ;;  %v3441_v57 = vld [vmem:[#allocation11 + $0xb8] sm:$0xff]  ;;  %2711 = vmatpush.bf16.msrb.mxu2 %v3433_v25 }
 0x98f   : > { %3677 = vrsqrt.f32 %v2067_v62  ;;  %v2018_v50 = vrot.slane %v2017_v37, 1  ;;  %v2020_v0 = vrot.slane %v4640_v45, 4  ;;  %vm2078_vm6 = vmor %vm2076_vm5, %vm2077_vm4  ;;  %vm2086_vm8 = vweird.f32 %v2067_v62  ;;  %2730 = vmatpush.bf16.msra.mxu3 %v3441_v57 }
 0x990   : > { %v2072_v21 = vmul.f32 %v3676_v22, %v2071_v1  ;;  %v3432_v1 = vld [vmem:[#allocation11 + $0x70] sm:$0xff] }
 0x991   : > { %v2019_v2 = vadd.f32 %v2018_v50, %v2017_v37  ;;  %v2021_v24 = vadd.f32 %v2020_v0, %v4640_v45  ;;  %v3440_v50 = vld [vmem:[#allocation11 + $0xb0] sm:$0xff] }
 0x992   : > { %v2073_v18 = vmul.f32 0.5, %v2072_v21  ;;  %2712 = vmatpush.bf16.msrb.mxu2 %v3432_v1 }
 0x993   : > { %v2028_v39 = vmul.f32 %v2019_v2, %v4201_v4  ;;  %v2022_v12 = vrot.slane %v2021_v24, 2  ;;  %v3423_v2 = vld [vmem:[#allocation11 + $0x28] sm:$0xff]  ;;  %2731 = vmatpush.bf16.msra.mxu3 %v3440_v50 }
 0x994   : > { %v2074_v42 = vsub.f32 1.5, %v2073_v18  ;;  %v3439_v18 = vld [vmem:[#allocation11 + $0xa8] sm:$0xff] }
 0x995   : > { %v3678_v43 = vpop.eup %3677  ;;  %v4646_v29 = vsub.f32 %v4633_v16, %v2028_v39  ;;  %v2023_v44 = vadd.f32 %v2022_v12, %v2021_v24  ;;  %v3447_v24 = vld [vmem:[#allocation11 + $0xe8] sm:$0xff] }
 0x996   : > { %v2075_v27 = vmul.f32 %v3676_v22, %v2074_v42  ;;  %v2081_v60 = vmul.f32 %v3678_v43, %v2067_v62  ;;  %vm2087_vm7 = vweird.f32 %v3678_v43  ;;  %v3448_v62 = vld [vmem:[#allocation11 + $0xf0] sm:$0xff]  ;;  %v3422_v42 = vld [vmem:[#allocation11 + $0x20] sm:$0xff] }
 0x997   : > { %v2036_v35 = vmul.f32 %v4646_v29, %v4646_v29  ;;  %v2024_v5 = vrot.slane %v2023_v44, 1  ;;  %vm2088_vm9 = vmor %vm2086_vm8, %vm2087_vm7  ;;  %2750 = vmatpush.bf16.msrb.mxu0 %v3448_v62  ;;  %2732 = vmatpush.bf16.msra.mxu3 %v3439_v18 }
 0x998   : > { %v2082_v6 = vmul.f32 %v3678_v43, %v2081_v60  ;;  %v2079_v47 = vsel %vm2078_vm6, %v3676_v22, %v2075_v27  ;;  %v3424_v22 = vld [vmem:[#allocation11 + $0x30] sm:$0xff] }
 0x999   : > { %v2050_v59 = vrot.slane %v2036_v35, 4  ;;  %v2025_v52 = vadd.f32 %v2024_v5, %v2023_v44  ;;  %v2110_v10 = vmul.f32 %v2079_v47, %v4620_v3  ;;  %2693 = vmatpush.bf16.msra.mxu1 %v3424_v22 }
 0x99a   : > { %v2083_v7 = vmul.f32 0.5, %v2082_v6 }
 0x99b   : > { %v2051_v8 = vadd.f32 %v2050_v59, %v2036_v35  ;;  %v2029_v9 = vmul.f32 %v2025_v52, %v4201_v4  ;;  %v2117_v23 = vmul.f32 %v4658_v14, %v2110_v10  ;;  %2751 = vmatpush.bf16.msrb.mxu0 %v3447_v24 }
 0x99c   : > { %v2084_v41 = vsub.f32 1.5, %v2083_v7 }
 0x99d   : > { %v2052_v13 = vrot.slane %v2051_v8, 2  ;;  %v4653_v51 = vsub.f32 %v4640_v45, %v2029_v9  ;;  %v2124_v40 = vadd.f32 %v4667_v28, %v2117_v23  ;;  %2694 = vmatpush.bf16.msra.mxu1 %v3423_v2  ;;  %v3443_v23 = vld [vmem:[#allocation11 + $0xc8] sm:$0xff] }
 0x99e   : > { %v2085_v15 = vmul.f32 %v3678_v43, %v2084_v41 }
 0x99f   : > { %v2053_v31 = vadd.f32 %v2052_v13, %v2051_v8  ;;  %v2037_v4 = vmul.f32 %v4653_v51, %v4653_v51 }
 0x9a0   : > { %v2089_v48 = vsel %vm2088_vm9, %v3678_v43, %v2085_v15  ;;  %v3446_v43 = vld [vmem:[#allocation11 + $0xe0] sm:$0xff] }
 0x9a1   : > { %v2111_v11 = vmul.f32 %v2089_v48, %v4626_v56  ;;  %v2054_v3 = vrot.slane %v2053_v31, 1  ;;  %v2056_v17 = vrot.slane %v2037_v4, 4  ;;  %2695 = vmatpush.bf16.msra.mxu1 %v3422_v42  ;;  %2752 = vmatpush.bf16.msrb.mxu0 %v3446_v43  ;;  %v3438_v48 = vld [vmem:[#allocation11 + $0xa0] sm:$0xff] }
 0x9a2   : > { %2733 = vmatpush.bf16.msra.mxu3 %v3438_v48 }
 0x9a3   : > { %v2055_v26 = vadd.f32 %v2054_v3, %v2053_v31  ;;  %v2057_v34 = vadd.f32 %v2056_v17, %v2037_v4  ;;  %v2118_v33 = vmul.f32 %v4658_v14, %v2111_v11  ;;  %v3445_v31 = vld [vmem:[#allocation11 + $0xd8] sm:$0xff]  ;;  %v3430_v4 = vld [vmem:[#allocation11 + $0x60] sm:$0xff]  ;;  %v3444_v11 = vld [vmem:[#allocation11 + $0xd0] sm:$0xff] }
 0x9a4   : > { %v3437_v3 = vld [vmem:[#allocation11 + $0x98] sm:$0xff]  ;;  %v3419_v17 = vld [vmem:[#allocation11 + $0x8] sm:$0xff] }
 0x9a5   : > { %v2064_v30 = vmul.f32 %v2055_v26, %v4232_v55  ;;  %v2058_v61 = vrot.slane %v2057_v34, 2  ;;  %v2125_v56 = vadd.f32 %v4667_v28, %v2118_v33  ;;  %2753 = vmatpush.bf16.msrb.mxu0 %v3445_v31  ;;  %v3436_v26 = vld [vmem:[#allocation11 + $0x90] sm:$0xff]  ;;  %v3442_v33 = vld [vmem:[#allocation11 + $0xc0] sm:$0xff] }
 0x9a6   : > { %2734 = vmatpush.bf16.msra.mxu3 %v3437_v3 }
 0x9a7   : > { %v2068_v49 = vadd.f32 1e-05, %v2064_v30  ;;  %v2059_v53 = vadd.f32 %v2058_v61, %v2057_v34  ;;  %v2128_v54 = vpack.c.bf16 %v2125_v56, %v2124_v40  ;;  %v3418_v34 = vld [vmem:[#allocation11] sm:$0xff]  ;;  %v3427_v30 = vld [vmem:[#allocation11 + $0x48] sm:$0xff] }
 0x9a8   : > { %v3435_v61 = vld [vmem:[#allocation11 + $0x88] sm:$0xff]  ;;  %v3426_v40 = vld [vmem:[#allocation11 + $0x40] sm:$0xff] }
 0x9a9   : > { %3679 = vrsqrt.f32 %v2068_v49  ;;  %v2060_v32 = vrot.slane %v2059_v53, 1  ;;  %2340 = vmatmul.bf16.vlgmr.msrb.gmra.mxu1 %v2128_v54  ;;  %2359 = vmatmul.bf16.vlgmr.msra.gmra.mxu2 %v2128_v54  ;;  %vm2096_vm11 = vweird.f32 %v2068_v49  ;;  %v3434_v56 = vld [vmem:[#allocation11 + $0x80] sm:$0xff] }
 0x9aa   : > { %2378 = vmatmul.bf16.vlgmr.msrb.gmra.mxu3 %v2128_v54  ;;  %2397 = vmatmul.bf16.vlgmr.msra.gmra.mxu0 %v2128_v54 }
 0x9ab   : > { %v2061_v58 = vadd.f32 %v2060_v32, %v2059_v53  ;;  %2754 = vmatpush.bf16.msrb.mxu0 %v3444_v11  ;;  %2735 = vmatpush.bf16.msra.mxu3 %v3436_v26 }
 0x9ad   : > { %v2065_v46 = vmul.f32 %v2061_v58, %v4232_v55  ;;  %v3431_v55 = vld [vmem:[#allocation11 + $0x68] sm:$0xff] }
 0x9ae   : > { %2713 = vmatpush.bf16.msrb.mxu2 %v3431_v55 }
 0x9af   : > { %v3680_v37 = vpop.eup %3679  ;;  %v2069_v19 = vadd.f32 1e-05, %v2065_v46  ;;  %2755 = vmatpush.bf16.msrb.mxu0 %v3443_v23  ;;  %2736 = vmatpush.bf16.msra.mxu3 %v3435_v61 }
 0x9b0   : > { %v2091_v0 = vmul.f32 %v3680_v37, %v2068_v49  ;;  %vm2097_vm10 = vweird.f32 %v3680_v37  ;;  %v2162_v49 = vld [vmem:[%s4737_s5] sm:$0xf] }
 0x9b1   : > { %3681 = vrsqrt.f32 %v2069_v19  ;;  %vm2098_vm12 = vmor %vm2096_vm11, %vm2097_vm10  ;;  %vm2106_vm14 = vweird.f32 %v2069_v19  ;;  %v2164_v32 = vperm.slane %v2162_v49, 0  ;;  %v2167_v58 = vperm.slane %v2162_v49, 3 }
 0x9b2   : > { %v2092_v21 = vmul.f32 %v3680_v37, %v2091_v0  ;;  %2714 = vmatpush.bf16.msrb.mxu2 %v3430_v4  ;;  %v2165_v22 = vperm.slane %v2162_v49, 1 }
 0x9b3   : > { %2756 = vmatpush.bf16.msrb.mxu0 %v3442_v33  ;;  %2737 = vmatpush.bf16.msra.mxu3 %v3434_v56 }
 0x9b4   : > { %v2093_v39 = vmul.f32 0.5, %v2092_v21 }
 0x9b6   : > { %v2094_v12 = vsub.f32 1.5, %v2093_v39 }
 0x9b7   : > { %v3682_v44 = vpop.eup %3681 }
 0x9b8   : > { %v2095_v27 = vmul.f32 %v3680_v37, %v2094_v12  ;;  %v2101_v60 = vmul.f32 %v3682_v44, %v2069_v19  ;;  %vm2107_vm13 = vweird.f32 %v3682_v44  ;;  %v2166_v19 = vperm.slane %v2162_v49, 2 }
 0x9b9   : > { %vm2108_vm15 = vmor %vm2106_vm14, %vm2107_vm13 }
 0x9ba   : > { %v2102_v35 = vmul.f32 %v3682_v44, %v2101_v60  ;;  %v2099_v5 = vsel %vm2098_vm12, %v3680_v37, %v2095_v27 }
 0x9bb   : > { %v2112_v52 = vmul.f32 %v2099_v5, %v4646_v29  ;;  %v3421_v29 = vld [vmem:[#allocation11 + $0x18] sm:$0xff] }
 0x9bc   : > { %v2103_v6 = vmul.f32 0.5, %v2102_v35  ;;  %2696 = vmatpush.bf16.msra.mxu1 %v3421_v29 }
 0x9bd   : > { %v2119_v9 = vmul.f32 %v4658_v14, %v2112_v52 }
 0x9be   : > { %v2104_v59 = vsub.f32 1.5, %v2103_v6 }
 0x9bf   : > { %v2126_v10 = vadd.f32 %v4667_v28, %v2119_v9 }
 0x9c0   : > { %v2105_v47 = vmul.f32 %v3682_v44, %v2104_v59 }
 0x9c2   : > { %v2109_v7 = vsel %vm2108_vm15, %v3682_v44, %v2105_v47 }
 0x9c3   : > { %v2113_v8 = vmul.f32 %v2109_v7, %v4653_v51  ;;  %v3420_v51 = vld [vmem:[#allocation11 + $0x10] sm:$0xff] }
 0x9c4   : > { %2697 = vmatpush.bf16.msra.mxu1 %v3420_v51 }
 0x9c5   : > { %v2120_v41 = vmul.f32 %v4658_v14, %v2113_v8  ;;  %v3429_v14 = vld [vmem:[#allocation11 + $0x58] sm:$0xff] }
 0x9c6   : > { %2715 = vmatpush.bf16.msrb.mxu2 %v3429_v14 }
 0x9c7   : > { %v2127_v13 = vadd.f32 %v4667_v28, %v2120_v41  ;;  %v3428_v28 = vld [vmem:[#allocation11 + $0x50] sm:$0xff] }
 0x9c8   : > { %2698 = vmatpush.bf16.msra.mxu1 %v3419_v17 }
 0x9c9   : > { %v2129_v15 = vpack.c.bf16 %v2127_v13, %v2126_v10 }
 0x9ca   : > { %2716 = vmatpush.bf16.msrb.mxu2 %v3428_v28 }
 0x9cb   : > { %2345 = vmatmul.bf16.gmra.mxu1 %v2129_v15  ;;  %2364 = vmatmul.bf16.gmra.mxu2 %v2129_v15 }
 0x9cc   : > { %2383 = vmatmul.bf16.gmra.mxu3 %v2129_v15  ;;  %2402 = vmatmul.bf16.gmra.mxu0 %v2129_v15 }
 0x9cd   : > { %2699 = vmatpush.bf16.msra.mxu1 %v3418_v34 }
 0x9ce   : > { %2717 = vmatpush.bf16.msrb.mxu2 %v3427_v30 }
 0x9d2   : > { %2718 = vmatpush.bf16.msrb.mxu2 %v3426_v40 }
 0xa26   : > { %v2341_v53 = vpop.f32.mrf.mxu1 }
 0xa27   : > { %v2398_v54 = vpop.f32.mrf.mxu0  ;;  %v2342_v63 = vadd.f32 %v2341_v53, %v2164_v32 }
 0xa28   : > { %v2399_v25 = vadd.f32 %v2398_v54, %v2167_v58  ;;  %v3598_v54 = vld [vmem:[%s4739_s7] ss:$0 sm:$0xff] }
 0xa29   : > { %v2408_v50 = vmax.f32 %v2342_v63, 0.0 }
 0xa2a   : > { %v2411_v21 = vmax.f32 %v2399_v25, 0.0 }
 0xa2c   : > { %v2360_v20 = vpop.f32.mrf.mxu2 }
 0xa2d   : > { %v2379_v46 = vpop.f32.mrf.mxu3  ;;  %v2361_v24 = vadd.f32 %v2360_v20, %v2165_v22 }
 0xa2e   : > { %v2343_v57 = vpop.f32.mrf.mxu1  ;;  %v2380_v18 = vadd.f32 %v2379_v46, %v2166_v19 }
 0xa2f   : > { %v2344_v62 = vadd.f32 %v2343_v57, %v2164_v32  ;;  %v2400_v37 = vpop.f32.mrf.mxu0  ;;  %v2409_v27 = vmax.f32 %v2361_v24, 0.0 }
 0xa30   : > { %v2401_v1 = vadd.f32 %v2400_v37, %v2167_v58  ;;  %v2410_v35 = vmax.f32 %v2380_v18, 0.0 }
 0xa31   : > { %v2412_v0 = vmax.f32 %v2344_v62, 0.0 }
 0xa32   : > { %v2415_v2 = vmax.f32 %v2401_v1, 0.0 }
 0xa33   : > { %v2424_v55 = vpack.c.bf16 %v2412_v0, %v2408_v50 }
 0xa34   : > { %v2427_v39 = vpack.c.bf16 %v2415_v2, %v2411_v21  ;;  %v2362_v12 = vpop.f32.mrf.mxu2 }
 0xa35   : > { %v2363_v42 = vadd.f32 %v2362_v12, %v2165_v22  ;;  %v2381_v43 = vpop.f32.mrf.mxu3  ;;  %2700 = vmatmul.bf16.vlgmr.msra.gmra.mxu1 %v2424_v55 }
 0xa36   : > { %v2382_v44 = vadd.f32 %v2381_v43, %v2166_v19  ;;  %2757 = vmatmul.bf16.vlgmr.msrb.gmra.mxu0 %v2427_v39 }
 0xa37   : > { %v2413_v60 = vmax.f32 %v2363_v42, 0.0 }
 0xa38   : > { %v2414_v5 = vmax.f32 %v2382_v44, 0.0 }
 0xa39   : > { %v2425_v6 = vpack.c.bf16 %v2413_v60, %v2409_v27 }
 0xa3a   : > { %v2426_v59 = vpack.c.bf16 %v2414_v5, %v2410_v35 }
 0xa3b   : > { %2719 = vmatmul.bf16.vlgmr.msrb.gmra.mxu2 %v2425_v6 }
 0xa3c   : > { %2738 = vmatmul.bf16.vlgmr.msra.gmra.mxu3 %v2426_v59 }
 0xa48   : > { %v2346_v52 = vpop.f32.mrf.mxu1 }
 0xa49   : > { %v2403_v47 = vpop.f32.mrf.mxu0  ;;  %v2347_v8 = vadd.f32 %v2346_v52, %v2164_v32 }
 0xa4a   : > { %v2404_v41 = vadd.f32 %v2403_v47, %v2167_v58 }
 0xa4b   : > { %v2416_v31 = vmax.f32 %v2347_v8, 0.0 }
 0xa4c   : > { %v2419_v48 = vmax.f32 %v2404_v41, 0.0 }
 0xa4e   : > { %v2365_v7 = vpop.f32.mrf.mxu2 }
 0xa4f   : > { %v2384_v9 = vpop.f32.mrf.mxu3  ;;  %v2366_v11 = vadd.f32 %v2365_v7, %v2165_v22 }
 0xa50   : > { %v2348_v10 = vpop.f32.mrf.mxu1  ;;  %v2385_v3 = vadd.f32 %v2384_v9, %v2166_v19 }
 0xa51   : > { %v2349_v13 = vadd.f32 %v2348_v10, %v2164_v32  ;;  %v2405_v15 = vpop.f32.mrf.mxu0  ;;  %v2417_v33 = vmax.f32 %v2366_v11, 0.0 }
 0xa52   : > { %v2406_v29 = vadd.f32 %v2405_v15, %v2167_v58  ;;  %v2418_v61 = vmax.f32 %v2385_v3, 0.0 }
 0xa53   : > { %v2420_v4 = vmax.f32 %v2349_v13, 0.0 }
 0xa54   : > { %v2423_v51 = vmax.f32 %v2406_v29, 0.0 }
 0xa55   : > { %v2428_v14 = vpack.c.bf16 %v2420_v4, %v2416_v31 }
 0xa56   : > { %v2431_v17 = vpack.c.bf16 %v2423_v51, %v2419_v48  ;;  %v2367_v23 = vpop.f32.mrf.mxu2 }
 0xa57   : > { %v2368_v28 = vadd.f32 %v2367_v23, %v2165_v22  ;;  %v2386_v26 = vpop.f32.mrf.mxu3  ;;  %2705 = vmatmul.bf16.gmra.mxu1 %v2428_v14 }
 0xa58   : > { %v2387_v34 = vadd.f32 %v2386_v26, %v2166_v19  ;;  %2762 = vmatmul.bf16.gmra.mxu0 %v2431_v17 }
 0xa59   : > { %v2421_v30 = vmax.f32 %v2368_v28, 0.0 }
 0xa5a   : > { %v2422_v40 = vmax.f32 %v2387_v34, 0.0 }
 0xa5b   : > { %v2429_v56 = vpack.c.bf16 %v2421_v30, %v2417_v33 }
 0xa5c   : > { %v2430_v49 = vpack.c.bf16 %v2422_v40, %v2418_v61 }
 0xa5d   : > { %2724 = vmatmul.bf16.gmra.mxu2 %v2429_v56 }
 0xa5e   : > { %2743 = vmatmul.bf16.gmra.mxu3 %v2430_v49 }
 0xab2   : > { %v2701_v53 = vpop.f32.mrf.mxu1 }
 0xab3   : > { %v2702_v32 = vadd.f32 %v3598_v54, %v2701_v53  ;;  %v2758_v46 = vpop.f32.mrf.mxu0 }
 0xaba   : > { %v2703_v57 = vpop.f32.mrf.mxu1 }
 0xabb   : > { %v2704_v62 = vadd.f32 %v3598_v54, %v2703_v57  ;;  %v2760_v21 = vpop.f32.mrf.mxu0 }
 0xabe   : > { %v2720_v58 = vpop.f32.mrf.mxu2 }
 0xabf   : > { %v2721_v20 = vadd.f32 %v2720_v58, %v2702_v32  ;;  %v2739_v63 = vpop.f32.mrf.mxu3 }
 0xac1   : > { %v2740_v25 = vadd.f32 %v2739_v63, %v2721_v20 }
 0xac3   : > { %v2759_v22 = vadd.f32 %v2758_v46, %v2740_v25 }
 0xac5   : > { %v2768_v37 = vadd.f32 %v2759_v22, %v4608_v36 }
 0xac6   : > { %v2722_v19 = vpop.f32.mrf.mxu2 }
 0xac7   : > { %2772 = vst [vmem:[%s4689_s4] sm:$0xff] %v2768_v37  ;;  %v2723_v1 = vadd.f32 %v2722_v19, %v2704_v62  ;;  %v2741_v50 = vpop.f32.mrf.mxu3 }
 0xac9   : > { %v2742_v0 = vadd.f32 %v2741_v50, %v2723_v1 }
 0xacb   : > { %v2761_v2 = vadd.f32 %v2760_v21, %v2742_v0 }
 0xacd   : > { %v2769_v24 = vadd.f32 %v2761_v2, %v4614_v38 }
 0xacf   : > { %2773 = vst [vmem:[%s4689_s4 + $0x8] sm:$0xff] %v2769_v24 }
 0xad4   : > { %v2706_v55 = vpop.f32.mrf.mxu1 }
 0xad5   : > { %v2707_v36 = vadd.f32 %v3598_v54, %v2706_v55  ;;  %v2763_v42 = vpop.f32.mrf.mxu0 }
 0xadc   : > { %v2708_v44 = vpop.f32.mrf.mxu1 }
 0xadd   : > { %v2709_v60 = vadd.f32 %v3598_v54, %v2708_v44  ;;  %v2765_v52 = vpop.f32.mrf.mxu0 }
 0xae0   : > { %v2725_v18 = vpop.f32.mrf.mxu2 }
 0xae1   : > { %v2726_v39 = vadd.f32 %v2725_v18, %v2707_v36  ;;  %v2744_v12 = vpop.f32.mrf.mxu3 }
 0xae3   : > { %v2745_v43 = vadd.f32 %v2744_v12, %v2726_v39 }
 0xae5   : > { %v2764_v27 = vadd.f32 %v2763_v42, %v2745_v43 }
 0xae7   : > { %v2770_v35 = vadd.f32 %v2764_v27, %v4633_v16 }
 0xae8   : > { %v2727_v5 = vpop.f32.mrf.mxu2 }
 0xae9   : > { %2774 = vst [vmem:[%s4689_s4 + $0x10] sm:$0xff] %v2770_v35  ;;  %v2728_v38 = vadd.f32 %v2727_v5, %v2709_v60  ;;  %v2746_v6 = vpop.f32.mrf.mxu3 }
 0xaeb   : > { %v2747_v59 = vadd.f32 %v2746_v6, %v2728_v38 }
 0xaed   : > { %v2766_v47 = vadd.f32 %v2765_v52, %v2747_v59 }
 0xaef   : > { %v2771_v7 = vadd.f32 %v2766_v47, %v4640_v45 }
 0xaf1   : > { %2775 = vst [vmem:[%s4689_s4 + $0x18] sm:$0xff] %v2771_v7 }
 0xaf2   : > { %3894 = shalt.err (!%p3891_p9)
}
 0xaf3   : > { %s3965_s18 = smov 128   ;;  %s3966_s4 = smov 8  }
 0xaf4   : > { %3473 = dma.vmem_to_hbm [thread:$0]  (%p4122_p0), %s2790_s12, 512, %s2792_s20, %s2777_s28, %s3965_s18, %s3965_s18, %s3966_s4  }
 0xaf5 PF: > { %s2806_s6 = sand.u32 1, %s3933_s21   ;;  %p4774_p10 = scmp.ge.s32.totalorder %s3945_s24, 2 }
 0xaf6   : > { %s2807_s29 = scalar_lea.sflag [#allocation4], %s2806_s6 }
 0xaf7   : > { %p3496_p11 = pnand %p4774_p10, %p4128_p6 }
 0xaf9   : > { %p3497_p12 = pneg %p3496_p11 }
 0xafb   : > { %3928 = dma.done.wait (%p3497_p12), %s2807_s29, 512  }
 0xafc   : > { %3930 = vsyncadd (%p3497_p12), %s2807_s29, 4294966784  ;;  %s4775_s17 = sld [smem:[#allocation19_spill]]  ;;  %p28_p2 = scmp.ge.s32.totalorder %s4098_s15, 4  }
 0xafd   : > { %s4776_s21 = smov %s3937_s22  ;;  %s4777_s22 = smov %s3941_s23 }
 0xafe   : > { %s4779_s24 = smov %s4098_s15  ;;  %30 = sbr.rel (!%p28_p2) target bundleno = 15 (0xf), region = 133 }
 0xb02   : > { %s4778_s23 = smov %s4775_s17 }
 0xb03   :  { %2813 = vsyncpa [#allocation3], 1 }
 0xb04   :  { %2815 = vsyncpa [#allocation3 + $0x1], 1 }
 0xb05   :  { %2816 = vsyncpa [#allocation6], 1 }
 0xb06   :  { %2817 = vsyncpa [#allocation9], 1 }
 0xb07   :  { %2818 = vsyncpa [#allocation12], 1 }
 0xb08   :  { %2819 = vsyncpa [#allocation4], 1 }
 0xb09   :  { %2821 = vsyncpa [#allocation4 + $0x1], 1 }

</bundles_post_ra>
